<compile_context>
chip_gen: v7x
topology: tpu7x:2x2x1
jax: 0.10.0
libtpu: 0.0.40
codegen_flags: <defaults>
</compile_context>

<pallas_src>
import jax
import jax.numpy as jnp
from jax.experimental import pallas as pl
from jax.experimental.pallas import tpu as pltpu


def lstm_kernel(x_ref, wih_ref, whh_ref, b_ref, wfc_ref, bfc_ref,
                out_ref, xp_ref):
    # x_ref:   (T*Bp, Ip)   time-major, batch/feature padded, flattened
    # wih_ref: (Ip, 4*Hp)   per-gate slots of width Hp (lane aligned)
    # whh_ref: (Hp, 4*Hp)
    # b_ref:   (1, 4*Hp)    b_ih + b_hh
    # wfc_ref: (Hp, Cp), bfc_ref: (1, Cp)
    # xp_ref:  (T*Bp, 4*Hp) scratch (hoisted input projection)
    Bp = out_ref.shape[0]
    Hp = whh_ref.shape[0]
    T = x_ref.shape[0] // Bp

    # Phase 1: one fat MXU matmul for the whole sequence, bias folded in.
    xp_ref[...] = (
        jnp.dot(x_ref[...], wih_ref[...], preferred_element_type=jnp.float32)
        + b_ref[...]
    )

    whh = whh_ref[...]  # hoist recurrent weight load out of the loop

    # h0 = c0 = 0; state kept in vregs via the fori_loop carry.
    h0 = jnp.zeros((Bp, Hp), jnp.float32)
    c0 = jnp.zeros((Bp, Hp), jnp.float32)

    def step(t, carry):
        h, c = carry
        base = pl.multiple_of(t * Bp, Bp)
        gates = (xp_ref[pl.ds(base, Bp), :]
                 + jnp.dot(h, whh, preferred_element_type=jnp.float32))

        # Each gate occupies a whole 128-lane-aligned slot -> aligned slices.
        i_g = jax.nn.sigmoid(gates[:, 0 * Hp:1 * Hp])
        f_g = jax.nn.sigmoid(gates[:, 1 * Hp:2 * Hp])
        g_g = jnp.tanh(gates[:, 2 * Hp:3 * Hp])
        o_g = jax.nn.sigmoid(gates[:, 3 * Hp:4 * Hp])

        c_new = f_g * c + i_g * g_g
        h_new = o_g * jnp.tanh(c_new)
        return (h_new, c_new)

    h_last, _ = jax.lax.fori_loop(0, T, step, (h0, c0), unroll=True)

    # Final linear layer on the last hidden state; lane-dense (Bp, Cp) store.
    out_ref[...] = (
        jnp.dot(h_last, wfc_ref[...], preferred_element_type=jnp.float32)
        + bfc_ref[...]
    )


def _round_up(x, m):
    return ((x + m - 1) // m) * m


def rnn_forward(x, params):
    """x: (B, T, I) float32 (batch_first, like PyTorch). Returns (B, num_classes)."""
    x = x.astype(jnp.float32)
    B, T, I = x.shape
    H = params["w_hh"].shape[1]
    C = params["w_fc"].shape[0]

    LANE, SUB = 128, 8
    Bp = _round_up(B, SUB)
    Ip = _round_up(I, LANE)
    Hp = _round_up(H, LANE)
    Cp = _round_up(C, LANE)

    # Time-major, zero-padded, flattened to (T*Bp, Ip).
    x_tm = jnp.transpose(x, (1, 0, 2))                                 # (T, B, I)
    x_pad = jnp.zeros((T, Bp, Ip), jnp.float32).at[:, :B, :I].set(x_tm)
    x_flat = x_pad.reshape(T * Bp, Ip)

    def scatter_gate_weights(w, rows, rows_pad):
        # w: (4H, rows) PyTorch layout -> (rows_pad, 4*Hp), gate k in its own
        # lane-aligned slot [k*Hp : k*Hp + H].
        out = jnp.zeros((rows_pad, 4 * Hp), jnp.float32)
        for k in range(4):
            blk = w[k * H:(k + 1) * H, :].T.astype(jnp.float32)        # (rows, H)
            out = out.at[:rows, k * Hp:k * Hp + H].set(blk)
        return out

    wih_p = scatter_gate_weights(params["w_ih"], I, Ip)                # (Ip, 4Hp)
    whh_p = scatter_gate_weights(params["w_hh"], H, Hp)                # (Hp, 4Hp)

    b = (params["b_ih"] + params["b_hh"]).astype(jnp.float32)          # (4H,)
    b_p = jnp.zeros((1, 4 * Hp), jnp.float32)
    for k in range(4):
        b_p = b_p.at[0, k * Hp:k * Hp + H].set(b[k * H:(k + 1) * H])

    wfc_p = jnp.zeros((Hp, Cp), jnp.float32).at[:H, :C].set(
        params["w_fc"].T.astype(jnp.float32))                          # (Hp, Cp)
    bfc_p = jnp.zeros((1, Cp), jnp.float32).at[0, :C].set(
        params["b_fc"].astype(jnp.float32))                            # (1, Cp)

    out_p = pl.pallas_call(
        lstm_kernel,
        out_shape=jax.ShapeDtypeStruct((Bp, Cp), jnp.float32),
        grid_spec=pltpu.PrefetchScalarGridSpec(
            num_scalar_prefetch=0,
            grid=(1,),
            in_specs=[
                pl.BlockSpec((T * Bp, Ip), lambda i: (0, 0)),      # x (whole seq)
                pl.BlockSpec((Ip, 4 * Hp), lambda i: (0, 0)),      # W_ih (gated)
                pl.BlockSpec((Hp, 4 * Hp), lambda i: (0, 0)),      # W_hh (gated)
                pl.BlockSpec((1, 4 * Hp), lambda i: (0, 0)),       # b_ih + b_hh
                pl.BlockSpec((Hp, Cp), lambda i: (0, 0)),          # W_fc^T
                pl.BlockSpec((1, Cp), lambda i: (0, 0)),           # b_fc
            ],
            out_specs=pl.BlockSpec((Bp, Cp), lambda i: (0, 0)),
            scratch_shapes=[
                pltpu.VMEM((T * Bp, 4 * Hp), jnp.float32),         # X @ W_ih + b
            ],
        ),
        compiler_params=pltpu.CompilerParams(
            dimension_semantics=("arbitrary",),
        ),
    )(x_flat, wih_p, whh_p, b_p, wfc_p, bfc_p)

    return out_p[:B, :C]


def rnn_forward_reference(x, params):
    """Pure-JAX reference matching nn.LSTM (batch_first) + nn.Linear on last step."""
    x = x.astype(jnp.float32)
    B, T, I = x.shape
    H = params["w_hh"].shape[1]
    h = jnp.zeros((B, H), jnp.float32)
    c = jnp.zeros((B, H), jnp.float32)
    b = params["b_ih"] + params["b_hh"]

    def step(carry, xt):
        h, c = carry
        gates = xt @ params["w_ih"].T + h @ params["w_hh"].T + b
        i_g = jax.nn.sigmoid(gates[:, 0 * H:1 * H])
        f_g = jax.nn.sigmoid(gates[:, 1 * H:2 * H])
        g_g = jnp.tanh(gates[:, 2 * H:3 * H])
        o_g = jax.nn.sigmoid(gates[:, 3 * H:4 * H])
        c = f_g * c + i_g * g_g
        h = o_g * jnp.tanh(c)
        return (h, c), None

    (h, c), _ = jax.lax.scan(step, (h, c), jnp.transpose(x, (1, 0, 2)))
    return h @ params["w_fc"].T + params["b_fc"]


def init_params(key, input_size, hidden_size, num_classes):
    """Deterministic init mirroring PyTorch's U(-1/sqrt(H), 1/sqrt(H)) shapes."""
    k = 1.0 / jnp.sqrt(jnp.float32(hidden_size))
    keys = jax.random.split(key, 6)
    u = lambda kk, shape: jax.random.uniform(kk, shape, jnp.float32, -k, k)
    return {
        "w_ih": u(keys[0], (4 * hidden_size, input_size)),
        "w_hh": u(keys[1], (4 * hidden_size, hidden_size)),
        "b_ih": u(keys[2], (4 * hidden_size,)),
        "b_hh": u(keys[3], (4 * hidden_size,)),
        "w_fc": u(keys[4], (num_classes, hidden_size)),
        "b_fc": u(keys[5], (num_classes,)),
    }


if __name__ == "__main__":
    hidden_size = 20
    input_size = 23
    num_classes = 2
    batch = 2
    seq_len = 8

    key = jax.random.PRNGKey(0)
    k_param, k_x = jax.random.split(key)
    params = init_params(k_param, input_size, hidden_size, num_classes)
    x = jax.random.normal(k_x, (batch, seq_len, input_size), jnp.float32)

    out = rnn_forward(x, params)
    out = jax.block_until_ready(out)

    ref = jax.block_until_ready(rnn_forward_reference(x, params))
    assert out.shape == (batch, num_classes)
    assert jnp.allclose(out, ref, atol=1e-5, rtol=1e-5), (out, ref)

    print("KERNEL_OK")
</pallas_src>

<mosaic_0001>
module attributes {stable_mosaic.version = 11 : i64} {
  func.func @lstm_kernel(%arg0: i32, %arg1: memref<64x128xf32, #tpu.memory_space<vmem>>, %arg2: memref<128x512xf32, #tpu.memory_space<vmem>>, %arg3: memref<128x512xf32, #tpu.memory_space<vmem>>, %arg4: memref<1x512xf32, #tpu.memory_space<vmem>>, %arg5: memref<128x128xf32, #tpu.memory_space<vmem>>, %arg6: memref<1x128xf32, #tpu.memory_space<vmem>>, %arg7: memref<8x128xf32, #tpu.memory_space<vmem>>, %arg8: memref<64x512xf32, #tpu.memory_space<vmem>>) attributes {dimension_semantics = [#tpu.dimension_semantics<arbitrary>], iteration_bounds = array<i64: 1>, scalar_prefetch = 0 : i64, scratch_operands = 1 : i64, tpu.core_type = #tpu.core_type<tc>, window_params = [{pipeline_mode = #tpu.pipeline_mode<synchronous>, transform_indices = @transform_0, window_bounds = array<i64: 64, 128>}, {pipeline_mode = #tpu.pipeline_mode<synchronous>, transform_indices = @transform_1, window_bounds = array<i64: 128, 512>}, {pipeline_mode = #tpu.pipeline_mode<synchronous>, transform_indices = @transform_2, window_bounds = array<i64: 128, 512>}, {pipeline_mode = #tpu.pipeline_mode<synchronous>, transform_indices = @transform_3, window_bounds = array<i64: 1, 512>}, {pipeline_mode = #tpu.pipeline_mode<synchronous>, transform_indices = @transform_4, window_bounds = array<i64: 128, 128>}, {pipeline_mode = #tpu.pipeline_mode<synchronous>, transform_indices = @transform_5, window_bounds = array<i64: 1, 128>}, {pipeline_mode = #tpu.pipeline_mode<synchronous>, transform_indices = @transform_6, window_bounds = array<i64: 8, 128>}]} {
    %c0 = arith.constant 0 : index
    %c0_0 = arith.constant 0 : index
    %0 = vector.load %arg1[%c0, %c0_0] : memref<64x128xf32, #tpu.memory_space<vmem>>, vector<64x128xf32>
    %c0_1 = arith.constant 0 : index
    %c0_2 = arith.constant 0 : index
    %1 = vector.load %arg2[%c0_1, %c0_2] : memref<128x512xf32, #tpu.memory_space<vmem>>, vector<128x512xf32>
    %cst = arith.constant dense<0.000000e+00> : vector<64x512xf32>
    %2 = tpu.matmul %0, %1, %cst {dimension_numbers = #tpu.dot_dimension_numbers<[1], [0], [0], [1], [0, 0, 1, 1], [], []>} : vector<64x128xf32>, vector<128x512xf32>, vector<64x512xf32> -> vector<64x512xf32>
    %c0_3 = arith.constant 0 : index
    %c0_4 = arith.constant 0 : index
    %3 = vector.load %arg4[%c0_3, %c0_4] : memref<1x512xf32, #tpu.memory_space<vmem>>, vector<1x512xf32>
    %4 = vector.broadcast %3 : vector<1x512xf32> to vector<64x512xf32>
    %5 = arith.addf %2, %4 : vector<64x512xf32>
    %c0_5 = arith.constant 0 : index
    %c0_6 = arith.constant 0 : index
    %6 = vector.load %arg8[%c0_5, %c0_6] : memref<64x512xf32, #tpu.memory_space<vmem>>, vector<64x512xf32>
    tpu.vector_store %arg8[%c0_5, %c0_6], %5 {strides = array<i32>} : memref<64x512xf32, #tpu.memory_space<vmem>>, vector<64x512xf32>,
    %c0_7 = arith.constant 0 : index
    %c0_8 = arith.constant 0 : index
    %7 = vector.load %arg3[%c0_7, %c0_8] : memref<128x512xf32, #tpu.memory_space<vmem>>, vector<128x512xf32>
    %cst_9 = arith.constant 0.000000e+00 : f32
    %8 = vector.broadcast %cst_9 : f32 to vector<8x128xf32>
    %cst_10 = arith.constant 0.000000e+00 : f32
    %9 = vector.broadcast %cst_10 : f32 to vector<8x128xf32>
    %c0_i32 = arith.constant 0 : i32
    %c8_i32 = arith.constant 8 : i32
    %10 = arith.muli %c0_i32, %c8_i32 : i32
    %11 = tpu.assume_multiple %10, 8 : i32
    %12 = arith.index_cast %11 : i32 to index
    %c0_11 = arith.constant 0 : index
    %13 = vector.load %arg8[%12, %c0_11] : memref<64x512xf32, #tpu.memory_space<vmem>>, vector<8x512xf32>
    %cst_12 = arith.constant dense<0.000000e+00> : vector<8x512xf32>
    %14 = tpu.matmul %8, %7, %cst_12 {dimension_numbers = #tpu.dot_dimension_numbers<[1], [0], [0], [1], [0, 0, 1, 1], [], []>} : vector<8x128xf32>, vector<128x512xf32>, vector<8x512xf32> -> vector<8x512xf32>
    %15 = arith.addf %13, %14 : vector<8x512xf32>
    %16 = vector.extract_strided_slice %15 {offsets = [0, 0], sizes = [8, 128], strides = [1, 1]} : vector<8x512xf32> to vector<8x128xf32>
    %17 = arith.negf %16 : vector<8x128xf32>
    %18 = math.exp %17 : vector<8x128xf32>
    %cst_13 = arith.constant 1.000000e+00 : f32
    %19 = vector.broadcast %cst_13 : f32 to vector<8x128xf32>
    %20 = arith.addf %19, %18 : vector<8x128xf32>
    %21 = arith.divf %19, %20 : vector<8x128xf32>
    %22 = vector.extract_strided_slice %15 {offsets = [0, 128], sizes = [8, 128], strides = [1, 1]} : vector<8x512xf32> to vector<8x128xf32>
    %23 = arith.negf %22 : vector<8x128xf32>
    %24 = math.exp %23 : vector<8x128xf32>
    %cst_14 = arith.constant 1.000000e+00 : f32
    %25 = vector.broadcast %cst_14 : f32 to vector<8x128xf32>
    %26 = arith.addf %25, %24 : vector<8x128xf32>
    %27 = arith.divf %25, %26 : vector<8x128xf32>
    %28 = vector.extract_strided_slice %15 {offsets = [0, 256], sizes = [8, 128], strides = [1, 1]} : vector<8x512xf32> to vector<8x128xf32>
    %29 = math.tanh %28 : vector<8x128xf32>
    %30 = vector.extract_strided_slice %15 {offsets = [0, 384], sizes = [8, 128], strides = [1, 1]} : vector<8x512xf32> to vector<8x128xf32>
    %31 = arith.negf %30 : vector<8x128xf32>
    %32 = math.exp %31 : vector<8x128xf32>
    %cst_15 = arith.constant 1.000000e+00 : f32
    %33 = vector.broadcast %cst_15 : f32 to vector<8x128xf32>
    %34 = arith.addf %33, %32 : vector<8x128xf32>
    %35 = arith.divf %33, %34 : vector<8x128xf32>
    %36 = arith.mulf %27, %9 : vector<8x128xf32>
    %37 = arith.mulf %21, %29 : vector<8x128xf32>
    %38 = arith.addf %36, %37 : vector<8x128xf32>
    %39 = math.tanh %38 : vector<8x128xf32>
    %40 = arith.mulf %35, %39 : vector<8x128xf32>
    %c1_i32 = arith.constant 1 : i32
    %c8_i32_16 = arith.constant 8 : i32
    %41 = arith.muli %c1_i32, %c8_i32_16 : i32
    %42 = tpu.assume_multiple %41, 8 : i32
    %43 = arith.index_cast %42 : i32 to index
    %c0_17 = arith.constant 0 : index
    %44 = vector.load %arg8[%43, %c0_17] : memref<64x512xf32, #tpu.memory_space<vmem>>, vector<8x512xf32>
    %cst_18 = arith.constant dense<0.000000e+00> : vector<8x512xf32>
    %45 = tpu.matmul %40, %7, %cst_18 {dimension_numbers = #tpu.dot_dimension_numbers<[1], [0], [0], [1], [0, 0, 1, 1], [], []>} : vector<8x128xf32>, vector<128x512xf32>, vector<8x512xf32> -> vector<8x512xf32>
    %46 = arith.addf %44, %45 : vector<8x512xf32>
    %47 = vector.extract_strided_slice %46 {offsets = [0, 0], sizes = [8, 128], strides = [1, 1]} : vector<8x512xf32> to vector<8x128xf32>
    %48 = arith.negf %47 : vector<8x128xf32>
    %49 = math.exp %48 : vector<8x128xf32>
    %cst_19 = arith.constant 1.000000e+00 : f32
    %50 = vector.broadcast %cst_19 : f32 to vector<8x128xf32>
    %51 = arith.addf %50, %49 : vector<8x128xf32>
    %52 = arith.divf %50, %51 : vector<8x128xf32>
    %53 = vector.extract_strided_slice %46 {offsets = [0, 128], sizes = [8, 128], strides = [1, 1]} : vector<8x512xf32> to vector<8x128xf32>
    %54 = arith.negf %53 : vector<8x128xf32>
    %55 = math.exp %54 : vector<8x128xf32>
    %cst_20 = arith.constant 1.000000e+00 : f32
    %56 = vector.broadcast %cst_20 : f32 to vector<8x128xf32>
    %57 = arith.addf %56, %55 : vector<8x128xf32>
    %58 = arith.divf %56, %57 : vector<8x128xf32>
    %59 = vector.extract_strided_slice %46 {offsets = [0, 256], sizes = [8, 128], strides = [1, 1]} : vector<8x512xf32> to vector<8x128xf32>
    %60 = math.tanh %59 : vector<8x128xf32>
    %61 = vector.extract_strided_slice %46 {offsets = [0, 384], sizes = [8, 128], strides = [1, 1]} : vector<8x512xf32> to vector<8x128xf32>
    %62 = arith.negf %61 : vector<8x128xf32>
    %63 = math.exp %62 : vector<8x128xf32>
    %cst_21 = arith.constant 1.000000e+00 : f32
    %64 = vector.broadcast %cst_21 : f32 to vector<8x128xf32>
    %65 = arith.addf %64, %63 : vector<8x128xf32>
    %66 = arith.divf %64, %65 : vector<8x128xf32>
    %67 = arith.mulf %58, %38 : vector<8x128xf32>
    %68 = arith.mulf %52, %60 : vector<8x128xf32>
    %69 = arith.addf %67, %68 : vector<8x128xf32>
    %70 = math.tanh %69 : vector<8x128xf32>
    %71 = arith.mulf %66, %70 : vector<8x128xf32>
    %c2_i32 = arith.constant 2 : i32
    %c8_i32_22 = arith.constant 8 : i32
    %72 = arith.muli %c2_i32, %c8_i32_22 : i32
    %73 = tpu.assume_multiple %72, 8 : i32
    %74 = arith.index_cast %73 : i32 to index
    %c0_23 = arith.constant 0 : index
    %75 = vector.load %arg8[%74, %c0_23] : memref<64x512xf32, #tpu.memory_space<vmem>>, vector<8x512xf32>
    %cst_24 = arith.constant dense<0.000000e+00> : vector<8x512xf32>
    %76 = tpu.matmul %71, %7, %cst_24 {dimension_numbers = #tpu.dot_dimension_numbers<[1], [0], [0], [1], [0, 0, 1, 1], [], []>} : vector<8x128xf32>, vector<128x512xf32>, vector<8x512xf32> -> vector<8x512xf32>
    %77 = arith.addf %75, %76 : vector<8x512xf32>
    %78 = vector.extract_strided_slice %77 {offsets = [0, 0], sizes = [8, 128], strides = [1, 1]} : vector<8x512xf32> to vector<8x128xf32>
    %79 = arith.negf %78 : vector<8x128xf32>
    %80 = math.exp %79 : vector<8x128xf32>
    %cst_25 = arith.constant 1.000000e+00 : f32
    %81 = vector.broadcast %cst_25 : f32 to vector<8x128xf32>
    %82 = arith.addf %81, %80 : vector<8x128xf32>
    %83 = arith.divf %81, %82 : vector<8x128xf32>
    %84 = vector.extract_strided_slice %77 {offsets = [0, 128], sizes = [8, 128], strides = [1, 1]} : vector<8x512xf32> to vector<8x128xf32>
    %85 = arith.negf %84 : vector<8x128xf32>
    %86 = math.exp %85 : vector<8x128xf32>
    %cst_26 = arith.constant 1.000000e+00 : f32
    %87 = vector.broadcast %cst_26 : f32 to vector<8x128xf32>
    %88 = arith.addf %87, %86 : vector<8x128xf32>
    %89 = arith.divf %87, %88 : vector<8x128xf32>
    %90 = vector.extract_strided_slice %77 {offsets = [0, 256], sizes = [8, 128], strides = [1, 1]} : vector<8x512xf32> to vector<8x128xf32>
    %91 = math.tanh %90 : vector<8x128xf32>
    %92 = vector.extract_strided_slice %77 {offsets = [0, 384], sizes = [8, 128], strides = [1, 1]} : vector<8x512xf32> to vector<8x128xf32>
    %93 = arith.negf %92 : vector<8x128xf32>
    %94 = math.exp %93 : vector<8x128xf32>
    %cst_27 = arith.constant 1.000000e+00 : f32
    %95 = vector.broadcast %cst_27 : f32 to vector<8x128xf32>
    %96 = arith.addf %95, %94 : vector<8x128xf32>
    %97 = arith.divf %95, %96 : vector<8x128xf32>
    %98 = arith.mulf %89, %69 : vector<8x128xf32>
    %99 = arith.mulf %83, %91 : vector<8x128xf32>
    %100 = arith.addf %98, %99 : vector<8x128xf32>
    %101 = math.tanh %100 : vector<8x128xf32>
    %102 = arith.mulf %97, %101 : vector<8x128xf32>
    %c3_i32 = arith.constant 3 : i32
    %c8_i32_28 = arith.constant 8 : i32
    %103 = arith.muli %c3_i32, %c8_i32_28 : i32
    %104 = tpu.assume_multiple %103, 8 : i32
    %105 = arith.index_cast %104 : i32 to index
    %c0_29 = arith.constant 0 : index
    %106 = vector.load %arg8[%105, %c0_29] : memref<64x512xf32, #tpu.memory_space<vmem>>, vector<8x512xf32>
    %cst_30 = arith.constant dense<0.000000e+00> : vector<8x512xf32>
    %107 = tpu.matmul %102, %7, %cst_30 {dimension_numbers = #tpu.dot_dimension_numbers<[1], [0], [0], [1], [0, 0, 1, 1], [], []>} : vector<8x128xf32>, vector<128x512xf32>, vector<8x512xf32> -> vector<8x512xf32>
    %108 = arith.addf %106, %107 : vector<8x512xf32>
    %109 = vector.extract_strided_slice %108 {offsets = [0, 0], sizes = [8, 128], strides = [1, 1]} : vector<8x512xf32> to vector<8x128xf32>
    %110 = arith.negf %109 : vector<8x128xf32>
    %111 = math.exp %110 : vector<8x128xf32>
    %cst_31 = arith.constant 1.000000e+00 : f32
    %112 = vector.broadcast %cst_31 : f32 to vector<8x128xf32>
    %113 = arith.addf %112, %111 : vector<8x128xf32>
    %114 = arith.divf %112, %113 : vector<8x128xf32>
    %115 = vector.extract_strided_slice %108 {offsets = [0, 128], sizes = [8, 128], strides = [1, 1]} : vector<8x512xf32> to vector<8x128xf32>
    %116 = arith.negf %115 : vector<8x128xf32>
    %117 = math.exp %116 : vector<8x128xf32>
    %cst_32 = arith.constant 1.000000e+00 : f32
    %118 = vector.broadcast %cst_32 : f32 to vector<8x128xf32>
    %119 = arith.addf %118, %117 : vector<8x128xf32>
    %120 = arith.divf %118, %119 : vector<8x128xf32>
    %121 = vector.extract_strided_slice %108 {offsets = [0, 256], sizes = [8, 128], strides = [1, 1]} : vector<8x512xf32> to vector<8x128xf32>
    %122 = math.tanh %121 : vector<8x128xf32>
    %123 = vector.extract_strided_slice %108 {offsets = [0, 384], sizes = [8, 128], strides = [1, 1]} : vector<8x512xf32> to vector<8x128xf32>
    %124 = arith.negf %123 : vector<8x128xf32>
    %125 = math.exp %124 : vector<8x128xf32>
    %cst_33 = arith.constant 1.000000e+00 : f32
    %126 = vector.broadcast %cst_33 : f32 to vector<8x128xf32>
    %127 = arith.addf %126, %125 : vector<8x128xf32>
    %128 = arith.divf %126, %127 : vector<8x128xf32>
    %129 = arith.mulf %120, %100 : vector<8x128xf32>
    %130 = arith.mulf %114, %122 : vector<8x128xf32>
    %131 = arith.addf %129, %130 : vector<8x128xf32>
    %132 = math.tanh %131 : vector<8x128xf32>
    %133 = arith.mulf %128, %132 : vector<8x128xf32>
    %c4_i32 = arith.constant 4 : i32
    %c8_i32_34 = arith.constant 8 : i32
    %134 = arith.muli %c4_i32, %c8_i32_34 : i32
    %135 = tpu.assume_multiple %134, 8 : i32
    %136 = arith.index_cast %135 : i32 to index
    %c0_35 = arith.constant 0 : index
    %137 = vector.load %arg8[%136, %c0_35] : memref<64x512xf32, #tpu.memory_space<vmem>>, vector<8x512xf32>
    %cst_36 = arith.constant dense<0.000000e+00> : vector<8x512xf32>
    %138 = tpu.matmul %133, %7, %cst_36 {dimension_numbers = #tpu.dot_dimension_numbers<[1], [0], [0], [1], [0, 0, 1, 1], [], []>} : vector<8x128xf32>, vector<128x512xf32>, vector<8x512xf32> -> vector<8x512xf32>
    %139 = arith.addf %137, %138 : vector<8x512xf32>
    %140 = vector.extract_strided_slice %139 {offsets = [0, 0], sizes = [8, 128], strides = [1, 1]} : vector<8x512xf32> to vector<8x128xf32>
    %141 = arith.negf %140 : vector<8x128xf32>
    %142 = math.exp %141 : vector<8x128xf32>
    %cst_37 = arith.constant 1.000000e+00 : f32
    %143 = vector.broadcast %cst_37 : f32 to vector<8x128xf32>
    %144 = arith.addf %143, %142 : vector<8x128xf32>
    %145 = arith.divf %143, %144 : vector<8x128xf32>
    %146 = vector.extract_strided_slice %139 {offsets = [0, 128], sizes = [8, 128], strides = [1, 1]} : vector<8x512xf32> to vector<8x128xf32>
    %147 = arith.negf %146 : vector<8x128xf32>
    %148 = math.exp %147 : vector<8x128xf32>
    %cst_38 = arith.constant 1.000000e+00 : f32
    %149 = vector.broadcast %cst_38 : f32 to vector<8x128xf32>
    %150 = arith.addf %149, %148 : vector<8x128xf32>
    %151 = arith.divf %149, %150 : vector<8x128xf32>
    %152 = vector.extract_strided_slice %139 {offsets = [0, 256], sizes = [8, 128], strides = [1, 1]} : vector<8x512xf32> to vector<8x128xf32>
    %153 = math.tanh %152 : vector<8x128xf32>
    %154 = vector.extract_strided_slice %139 {offsets = [0, 384], sizes = [8, 128], strides = [1, 1]} : vector<8x512xf32> to vector<8x128xf32>
    %155 = arith.negf %154 : vector<8x128xf32>
    %156 = math.exp %155 : vector<8x128xf32>
    %cst_39 = arith.constant 1.000000e+00 : f32
    %157 = vector.broadcast %cst_39 : f32 to vector<8x128xf32>
    %158 = arith.addf %157, %156 : vector<8x128xf32>
    %159 = arith.divf %157, %158 : vector<8x128xf32>
    %160 = arith.mulf %151, %131 : vector<8x128xf32>
    %161 = arith.mulf %145, %153 : vector<8x128xf32>
    %162 = arith.addf %160, %161 : vector<8x128xf32>
    %163 = math.tanh %162 : vector<8x128xf32>
    %164 = arith.mulf %159, %163 : vector<8x128xf32>
    %c5_i32 = arith.constant 5 : i32
    %c8_i32_40 = arith.constant 8 : i32
    %165 = arith.muli %c5_i32, %c8_i32_40 : i32
    %166 = tpu.assume_multiple %165, 8 : i32
    %167 = arith.index_cast %166 : i32 to index
    %c0_41 = arith.constant 0 : index
    %168 = vector.load %arg8[%167, %c0_41] : memref<64x512xf32, #tpu.memory_space<vmem>>, vector<8x512xf32>
    %cst_42 = arith.constant dense<0.000000e+00> : vector<8x512xf32>
    %169 = tpu.matmul %164, %7, %cst_42 {dimension_numbers = #tpu.dot_dimension_numbers<[1], [0], [0], [1], [0, 0, 1, 1], [], []>} : vector<8x128xf32>, vector<128x512xf32>, vector<8x512xf32> -> vector<8x512xf32>
    %170 = arith.addf %168, %169 : vector<8x512xf32>
    %171 = vector.extract_strided_slice %170 {offsets = [0, 0], sizes = [8, 128], strides = [1, 1]} : vector<8x512xf32> to vector<8x128xf32>
    %172 = arith.negf %171 : vector<8x128xf32>
    %173 = math.exp %172 : vector<8x128xf32>
    %cst_43 = arith.constant 1.000000e+00 : f32
    %174 = vector.broadcast %cst_43 : f32 to vector<8x128xf32>
    %175 = arith.addf %174, %173 : vector<8x128xf32>
    %176 = arith.divf %174, %175 : vector<8x128xf32>
    %177 = vector.extract_strided_slice %170 {offsets = [0, 128], sizes = [8, 128], strides = [1, 1]} : vector<8x512xf32> to vector<8x128xf32>
    %178 = arith.negf %177 : vector<8x128xf32>
    %179 = math.exp %178 : vector<8x128xf32>
    %cst_44 = arith.constant 1.000000e+00 : f32
    %180 = vector.broadcast %cst_44 : f32 to vector<8x128xf32>
    %181 = arith.addf %180, %179 : vector<8x128xf32>
    %182 = arith.divf %180, %181 : vector<8x128xf32>
    %183 = vector.extract_strided_slice %170 {offsets = [0, 256], sizes = [8, 128], strides = [1, 1]} : vector<8x512xf32> to vector<8x128xf32>
    %184 = math.tanh %183 : vector<8x128xf32>
    %185 = vector.extract_strided_slice %170 {offsets = [0, 384], sizes = [8, 128], strides = [1, 1]} : vector<8x512xf32> to vector<8x128xf32>
    %186 = arith.negf %185 : vector<8x128xf32>
    %187 = math.exp %186 : vector<8x128xf32>
    %cst_45 = arith.constant 1.000000e+00 : f32
    %188 = vector.broadcast %cst_45 : f32 to vector<8x128xf32>
    %189 = arith.addf %188, %187 : vector<8x128xf32>
    %190 = arith.divf %188, %189 : vector<8x128xf32>
    %191 = arith.mulf %182, %162 : vector<8x128xf32>
    %192 = arith.mulf %176, %184 : vector<8x128xf32>
    %193 = arith.addf %191, %192 : vector<8x128xf32>
    %194 = math.tanh %193 : vector<8x128xf32>
    %195 = arith.mulf %190, %194 : vector<8x128xf32>
    %c6_i32 = arith.constant 6 : i32
    %c8_i32_46 = arith.constant 8 : i32
    %196 = arith.muli %c6_i32, %c8_i32_46 : i32
    %197 = tpu.assume_multiple %196, 8 : i32
    %198 = arith.index_cast %197 : i32 to index
    %c0_47 = arith.constant 0 : index
    %199 = vector.load %arg8[%198, %c0_47] : memref<64x512xf32, #tpu.memory_space<vmem>>, vector<8x512xf32>
    %cst_48 = arith.constant dense<0.000000e+00> : vector<8x512xf32>
    %200 = tpu.matmul %195, %7, %cst_48 {dimension_numbers = #tpu.dot_dimension_numbers<[1], [0], [0], [1], [0, 0, 1, 1], [], []>} : vector<8x128xf32>, vector<128x512xf32>, vector<8x512xf32> -> vector<8x512xf32>
    %201 = arith.addf %199, %200 : vector<8x512xf32>
    %202 = vector.extract_strided_slice %201 {offsets = [0, 0], sizes = [8, 128], strides = [1, 1]} : vector<8x512xf32> to vector<8x128xf32>
    %203 = arith.negf %202 : vector<8x128xf32>
    %204 = math.exp %203 : vector<8x128xf32>
    %cst_49 = arith.constant 1.000000e+00 : f32
    %205 = vector.broadcast %cst_49 : f32 to vector<8x128xf32>
    %206 = arith.addf %205, %204 : vector<8x128xf32>
    %207 = arith.divf %205, %206 : vector<8x128xf32>
    %208 = vector.extract_strided_slice %201 {offsets = [0, 128], sizes = [8, 128], strides = [1, 1]} : vector<8x512xf32> to vector<8x128xf32>
    %209 = arith.negf %208 : vector<8x128xf32>
    %210 = math.exp %209 : vector<8x128xf32>
    %cst_50 = arith.constant 1.000000e+00 : f32
    %211 = vector.broadcast %cst_50 : f32 to vector<8x128xf32>
    %212 = arith.addf %211, %210 : vector<8x128xf32>
    %213 = arith.divf %211, %212 : vector<8x128xf32>
    %214 = vector.extract_strided_slice %201 {offsets = [0, 256], sizes = [8, 128], strides = [1, 1]} : vector<8x512xf32> to vector<8x128xf32>
    %215 = math.tanh %214 : vector<8x128xf32>
    %216 = vector.extract_strided_slice %201 {offsets = [0, 384], sizes = [8, 128], strides = [1, 1]} : vector<8x512xf32> to vector<8x128xf32>
    %217 = arith.negf %216 : vector<8x128xf32>
    %218 = math.exp %217 : vector<8x128xf32>
    %cst_51 = arith.constant 1.000000e+00 : f32
    %219 = vector.broadcast %cst_51 : f32 to vector<8x128xf32>
    %220 = arith.addf %219, %218 : vector<8x128xf32>
    %221 = arith.divf %219, %220 : vector<8x128xf32>
    %222 = arith.mulf %213, %193 : vector<8x128xf32>
    %223 = arith.mulf %207, %215 : vector<8x128xf32>
    %224 = arith.addf %222, %223 : vector<8x128xf32>
    %225 = math.tanh %224 : vector<8x128xf32>
    %226 = arith.mulf %221, %225 : vector<8x128xf32>
    %c7_i32 = arith.constant 7 : i32
    %c8_i32_52 = arith.constant 8 : i32
    %227 = arith.muli %c7_i32, %c8_i32_52 : i32
    %228 = tpu.assume_multiple %227, 8 : i32
    %229 = arith.index_cast %228 : i32 to index
    %c0_53 = arith.constant 0 : index
    %230 = vector.load %arg8[%229, %c0_53] : memref<64x512xf32, #tpu.memory_space<vmem>>, vector<8x512xf32>
    %cst_54 = arith.constant dense<0.000000e+00> : vector<8x512xf32>
    %231 = tpu.matmul %226, %7, %cst_54 {dimension_numbers = #tpu.dot_dimension_numbers<[1], [0], [0], [1], [0, 0, 1, 1], [], []>} : vector<8x128xf32>, vector<128x512xf32>, vector<8x512xf32> -> vector<8x512xf32>
    %232 = arith.addf %230, %231 : vector<8x512xf32>
    %233 = vector.extract_strided_slice %232 {offsets = [0, 0], sizes = [8, 128], strides = [1, 1]} : vector<8x512xf32> to vector<8x128xf32>
    %234 = arith.negf %233 : vector<8x128xf32>
    %235 = math.exp %234 : vector<8x128xf32>
    %cst_55 = arith.constant 1.000000e+00 : f32
    %236 = vector.broadcast %cst_55 : f32 to vector<8x128xf32>
    %237 = arith.addf %236, %235 : vector<8x128xf32>
    %238 = arith.divf %236, %237 : vector<8x128xf32>
    %239 = vector.extract_strided_slice %232 {offsets = [0, 128], sizes = [8, 128], strides = [1, 1]} : vector<8x512xf32> to vector<8x128xf32>
    %240 = arith.negf %239 : vector<8x128xf32>
    %241 = math.exp %240 : vector<8x128xf32>
    %cst_56 = arith.constant 1.000000e+00 : f32
    %242 = vector.broadcast %cst_56 : f32 to vector<8x128xf32>
    %243 = arith.addf %242, %241 : vector<8x128xf32>
    %244 = arith.divf %242, %243 : vector<8x128xf32>
    %245 = vector.extract_strided_slice %232 {offsets = [0, 256], sizes = [8, 128], strides = [1, 1]} : vector<8x512xf32> to vector<8x128xf32>
    %246 = math.tanh %245 : vector<8x128xf32>
    %247 = vector.extract_strided_slice %232 {offsets = [0, 384], sizes = [8, 128], strides = [1, 1]} : vector<8x512xf32> to vector<8x128xf32>
    %248 = arith.negf %247 : vector<8x128xf32>
    %249 = math.exp %248 : vector<8x128xf32>
    %cst_57 = arith.constant 1.000000e+00 : f32
    %250 = vector.broadcast %cst_57 : f32 to vector<8x128xf32>
    %251 = arith.addf %250, %249 : vector<8x128xf32>
    %252 = arith.divf %250, %251 : vector<8x128xf32>
    %253 = arith.mulf %244, %224 : vector<8x128xf32>
    %254 = arith.mulf %238, %246 : vector<8x128xf32>
    %255 = arith.addf %253, %254 : vector<8x128xf32>
    %256 = math.tanh %255 : vector<8x128xf32>
    %257 = arith.mulf %252, %256 : vector<8x128xf32>
    %c8_i32_58 = arith.constant 8 : i32
    %c0_59 = arith.constant 0 : index
    %c0_60 = arith.constant 0 : index
    %258 = vector.load %arg5[%c0_59, %c0_60] : memref<128x128xf32, #tpu.memory_space<vmem>>, vector<128x128xf32>
    %cst_61 = arith.constant dense<0.000000e+00> : vector<8x128xf32>
    %259 = tpu.matmul %257, %258, %cst_61 {dimension_numbers = #tpu.dot_dimension_numbers<[1], [0], [0], [1], [0, 0, 1, 1], [], []>} : vector<8x128xf32>, vector<128x128xf32>, vector<8x128xf32> -> vector<8x128xf32>
    %c0_62 = arith.constant 0 : index
    %c0_63 = arith.constant 0 : index
    %260 = vector.load %arg6[%c0_62, %c0_63] : memref<1x128xf32, #tpu.memory_space<vmem>>, vector<1x128xf32>
    %261 = vector.broadcast %260 : vector<1x128xf32> to vector<8x128xf32>
    %262 = arith.addf %259, %261 : vector<8x128xf32>
    %c0_64 = arith.constant 0 : index
    %c0_65 = arith.constant 0 : index
    %263 = vector.load %arg7[%c0_64, %c0_65] : memref<8x128xf32, #tpu.memory_space<vmem>>, vector<8x128xf32>
    tpu.vector_store %arg7[%c0_64, %c0_65], %262 {strides = array<i32>} : memref<8x128xf32, #tpu.memory_space<vmem>>, vector<8x128xf32>,
    return
  }
  func.func @transform_0(%arg0: i32) -> (i32, i32) {
    %c0_i32 = arith.constant 0 : i32
    %c0_i32_0 = arith.constant 0 : i32
    %c0_i32_1 = arith.constant 0 : i32
    return %c0_i32, %c0_i32_0 : i32, i32
  }
  func.func @transform_1(%arg0: i32) -> (i32, i32) {
    %c0_i32 = arith.constant 0 : i32
    %c0_i32_0 = arith.constant 0 : i32
    %c0_i32_1 = arith.constant 0 : i32
    return %c0_i32, %c0_i32_0 : i32, i32
  }
  func.func @transform_2(%arg0: i32) -> (i32, i32) {
    %c0_i32 = arith.constant 0 : i32
    %c0_i32_0 = arith.constant 0 : i32
    %c0_i32_1 = arith.constant 0 : i32
    return %c0_i32, %c0_i32_0 : i32, i32
  }
  func.func @transform_3(%arg0: i32) -> (i32, i32) {
    %c0_i32 = arith.constant 0 : i32
    %c0_i32_0 = arith.constant 0 : i32
    %c0_i32_1 = arith.constant 0 : i32
    return %c0_i32, %c0_i32_0 : i32, i32
  }
  func.func @transform_4(%arg0: i32) -> (i32, i32) {
    %c0_i32 = arith.constant 0 : i32
    %c0_i32_0 = arith.constant 0 : i32
    %c0_i32_1 = arith.constant 0 : i32
    return %c0_i32, %c0_i32_0 : i32, i32
  }
  func.func @transform_5(%arg0: i32) -> (i32, i32) {
    %c0_i32 = arith.constant 0 : i32
    %c0_i32_0 = arith.constant 0 : i32
    %c0_i32_1 = arith.constant 0 : i32
    return %c0_i32, %c0_i32_0 : i32, i32
  }
  func.func @transform_6(%arg0: i32) -> (i32, i32) {
    %c0_i32 = arith.constant 0 : i32
    %c0_i32_0 = arith.constant 0 : i32
    %c0_i32_1 = arith.constant 0 : i32
    return %c0_i32, %c0_i32_0 : i32, i32
  }
}

</mosaic_0001>

<bundles_post_ra>
// kernel: tpu_custom_call.1
= control target key start
LH: loop header
LB: loop body
LE: loop exit
PB: predicated region body
PF: predicated region fallthrough
CT: control target
= control target key end

     0   :  { %11 = vsyncpa [#allocation4], 0  ;;  %s3583_s0 = inlined_call_operand.hbm [shape: f32[64,128], index: 0, kind: input, shape index: {}]   ;;  %s3584_s1 = inlined_call_operand.hbm [shape: f32[128,512], index: 1, kind: input, shape index: {}]   ;;  %s3585_s2 = inlined_call_operand.hbm [shape: f32[128,512], index: 2, kind: input, shape index: {}]   ;;  %s3586_s3 = inlined_call_operand.vmem [shape: f32[1,512], index: 3, kind: input, shape index: {}]   ;;  %s3587_s4 = inlined_call_operand.hbm [shape: f32[128,128], index: 4, kind: input, shape index: {}]   ;;  %s3588_s5 = inlined_call_operand.vmem [shape: f32[1,128], index: 5, kind: input, shape index: {}]   ;;  %s3589_s6 = inlined_call_operand.hbm [shape: f32[8,128], index: 6, kind: output, shape index: {}]  }
   0x1   :  { %12 = vsyncpa [#allocation7], 0 }
   0x2   :  { %13 = vsyncpa [#allocation10], 0 }
   0x3   :  { %14 = vsyncpa [#allocation5], 0  ;;  %s3028_s21 = smov [#allocation6]   ;;  %s2910_s25 = scalar_lea.hbm %s3584_s1, 8192 }
   0x4   :  { %s32_s22 = sshll.u32 %s3028_s21, 4  ;;  %p2911_p0 = scmp.ne.s32.totalorder %s3584_s1, %s2910_s25  ;;  %s33_s22 = int_to_ptr.vmem [resolvable:$true] %s32_s22 }
   0x5   :  { %p2914_p1 = scmp.lt.u32.totalorder %s2910_s25, %s3584_s1 }
   0x7   :  { %p2916_p2 = pnand %p2914_p1, %p2911_p0 }
   0x9   :  { %2919 = shalt.err (!%p2916_p2)
}
   0xa   :  { %s2920_s30 = scalar_lea.vmem %s33_s22, 8192  ;;  %p2925_p4 = scmp.lt.s32.totalorder %s33_s22, %s33_s22 }
   0xb   :  { %p2921_p3 = scmp.ne.s32.totalorder %s33_s22, %s2920_s30  ;;  %p2926_p5 = scmp.lt.s32.totalorder %s2920_s30, %s2920_s30 }
   0xd   :  { %p2927_p6 = por %p2926_p5, %p2925_p4 }
   0xf   :  { %p2928_p7 = pnand %p2927_p6, %p2921_p3 }
  0x11   :  { %2931 = shalt.err (!%p2928_p7)
}
  0x12   :  { %s3029_s7 = smov 512   ;;  %s3030_s8 = smov 32  }
  0x13   :  { %38 = dma.hbm_to_vmem [thread:$0]  %s3584_s1, 8192, %s33_s22, [#allocation7], %s3029_s7, %s3029_s7, %s3030_s8  }
  0x14   :  { %s3031_s11 = smov [#allocation3]   ;;  %s2932_s15 = scalar_lea.hbm %s3583_s0, 1024 }
  0x15   :  { %s20_s12 = sshll.u32 %s3031_s11, 4  ;;  %p2933_p8 = scmp.ne.s32.totalorder %s3583_s0, %s2932_s15  ;;  %s21_s12 = int_to_ptr.vmem [resolvable:$true] %s20_s12 }
  0x16   :  { %p2936_p9 = scmp.lt.u32.totalorder %s2932_s15, %s3583_s0 }
  0x18   :  { %p2938_p10 = pnand %p2936_p9, %p2933_p8 }
  0x1a   :  { %2941 = shalt.err (!%p2938_p10)
}
  0x1b   :  { %s2942_s20 = scalar_lea.vmem %s21_s12, 1024  ;;  %p2947_p12 = scmp.lt.s32.totalorder %s21_s12, %s21_s12 }
  0x1c   :  { %p2943_p11 = scmp.ne.s32.totalorder %s21_s12, %s2942_s20  ;;  %p2948_p13 = scmp.lt.s32.totalorder %s2942_s20, %s2942_s20 }
  0x1e   :  { %p2949_p0 = por %p2948_p13, %p2947_p12 }
  0x20   :  { %p2950_p1 = pnand %p2949_p0, %p2943_p11 }
  0x22   :  { %2953 = shalt.err (!%p2950_p1)
}
  0x23   :  { %s3032_s1 = smov 128   ;;  %s3033_s21 = smov 8  }
  0x24   :  { %26 = dma.hbm_to_vmem [thread:$0]  %s3583_s0, 1024, %s21_s12, [#allocation4], %s3032_s1, %s3032_s1, %s3033_s21  }
  0x25   :  { %s3034_s24 = smov [#allocation8]   ;;  %s3035_s26 = smov [#allocation9]  }
  0x26   :  { %s44_s25 = sshll.u32 %s3034_s24, 4  ;;  %s58_s27 = sshll.u32 %s3035_s26, 4  ;;  %s45_s25 = int_to_ptr.vmem [resolvable:$true] %s44_s25  ;;  %s3105_s27 = int_to_ptr.vmem [resolvable:$true] %s58_s27 }
  0x27   :  { %s2954_s30 = scalar_lea.hbm %s3585_s2, 8192 }
  0x28   :  { %p2955_p2 = scmp.ne.s32.totalorder %s3585_s2, %s2954_s30  ;;  %p2958_p3 = scmp.lt.u32.totalorder %s2954_s30, %s3585_s2 }
  0x2a   :  { %p2960_p4 = pnand %p2958_p3, %p2955_p2 }
  0x2c   :  { %2963 = shalt.err (!%p2960_p4)
}
  0x2d   :  { %s2964_s0 = scalar_lea.vmem %s45_s25, 8192  ;;  %p2969_p6 = scmp.lt.s32.totalorder %s45_s25, %s45_s25 }
  0x2e   :  { %p2965_p5 = scmp.ne.s32.totalorder %s45_s25, %s2964_s0  ;;  %p2970_p7 = scmp.lt.s32.totalorder %s2964_s0, %s2964_s0 }
  0x30   :  { %p2971_p8 = por %p2970_p7, %p2969_p6 }
  0x32   :  { %p2972_p9 = pnand %p2971_p8, %p2965_p5 }
  0x34   :  { %2975 = shalt.err (!%p2972_p9)
}
  0x35   :  { %50 = dma.hbm_to_vmem [thread:$0]  %s3585_s2, 8192, %s45_s25, [#allocation7], %s3029_s7, %s3029_s7, %s3030_s8  }
  0x36   :  { %s2976_s17 = scalar_lea.hbm %s3587_s4, 2048 }
  0x37   :  { %p2977_p10 = scmp.ne.s32.totalorder %s3587_s4, %s2976_s17  ;;  %p2980_p11 = scmp.lt.u32.totalorder %s2976_s17, %s3587_s4 }
  0x39   :  { %p2982_p12 = pnand %p2980_p11, %p2977_p10 }
  0x3b   :  { %2985 = shalt.err (!%p2982_p12)
}
  0x3c   :  { %s2986_s23 = scalar_lea.vmem %s3105_s27, 2048  ;;  %p2991_p0 = scmp.lt.s32.totalorder %s3105_s27, %s3105_s27 }
  0x3d   :  { %p2987_p13 = scmp.ne.s32.totalorder %s3105_s27, %s2986_s23  ;;  %p2992_p1 = scmp.lt.s32.totalorder %s2986_s23, %s2986_s23 }
  0x3f   :  { %p2993_p2 = por %p2992_p1, %p2991_p0 }
  0x41   :  { %p2994_p3 = pnand %p2993_p2, %p2987_p13 }
  0x43   :  { %2997 = shalt.err (!%p2994_p3)
}
  0x44   :  { %64 = dma.hbm_to_vmem [thread:$0]  %s3587_s4, 2048, %s3105_s27, [#allocation10], %s3032_s1, %s3032_s1, %s3033_s21  }
  0x45   :  { %3020 = dma.done.wait [#allocation4], 1024  }
  0x46   :  { %3021 = vsyncadd [#allocation4], 4294966272 }
  0x47   :  { %3022 = dma.done.wait [#allocation7], 16384  }
  0x48   :  { %3023 = vsyncadd [#allocation7], 4294950912 }
  0x49   :  { %3024 = dma.done.wait [#allocation10], 2048  }
  0x4a   :  { %3025 = vsyncadd [#allocation10], 4294965248  ;;  %v3036_v0 = vmov 0.0   ;;  %v88_v1 = vld [vmem:[#allocation6 + $0x8] sm:$0xff]  ;;  %v90_v3 = vld [vmem:[#allocation6 + $0x18] sm:$0xff]  ;;  %vm3038_vm0 = vmmov 0  }
  0x4b   :  { %237 = vmatprep.mubr.f32.mxu0 %v3036_v0  ;;  %350 = vmatprep.mubr.f32.mxu1 %v3036_v0  ;;  %v92_v2 = vld [vmem:[#allocation6 + $0x28] sm:$0xff]  ;;  %v94_v5 = vld [vmem:[#allocation6 + $0x38] sm:$0xff]  ;;  %v87_v6 = vld [vmem:[#allocation6] sm:$0xff]  ;;  %s3039_s21 = smov [#allocation11]  }
  0x4c   :  { %v2106_v4 = vpack.c.bf16 %v92_v2, %v88_v1  ;;  %v91_v7 = vld [vmem:[#allocation6 + $0x20] sm:$0xff]  ;;  %v2138_v8 = vpack.c.bf16 %v94_v5, %v90_v3  ;;  %v89_v10 = vld [vmem:[#allocation6 + $0x10] sm:$0xff]  ;;  %v96_v12 = vld [vmem:[#allocation6 + $0x48] sm:$0xff]  ;;  %s2011_s24 = sshll.u32 %s3039_s21, 4  ;;  %s2012_s24 = int_to_ptr.vmem [resolvable:$true] %s2011_s24 }
  0x4d   :  { %v2108_v9 = vpack.c.bf16 %v91_v7, %v87_v6  ;;  %v93_v11 = vld [vmem:[#allocation6 + $0x30] sm:$0xff]  ;;  %v100_v14 = vld [vmem:[#allocation6 + $0x68] sm:$0xff]  ;;  %v98_v15 = vld [vmem:[#allocation6 + $0x58] sm:$0xff]  ;;  %s2998_s25 = scalar_lea.vmem %s2012_s24, 128  ;;  %p3003_p5 = scmp.lt.s32.totalorder %s2012_s24, %s2012_s24 }
  0x4e   :  { %2107 = vmatprep.subr.bf16.mxu0 %v2106_v4  ;;  %v2140_v13 = vpack.c.bf16 %v93_v11, %v89_v10  ;;  %v102_v16 = vld [vmem:[#allocation6 + $0x78] sm:$0xff]  ;;  %2139 = vmatprep.subr.bf16.mxu1 %v2138_v8  ;;  %v2110_v17 = vpack.c.bf16 %v100_v14, %v96_v12  ;;  %v95_v19 = vld [vmem:[#allocation6 + $0x40] sm:$0xff]  ;;  %v97_v21 = vld [vmem:[#allocation6 + $0x50] sm:$0xff]  ;;  %p2999_p4 = scmp.ne.s32.totalorder %s2012_s24, %s2998_s25  ;;  %p3004_p6 = scmp.lt.s32.totalorder %s2998_s25, %s2998_s25 }
  0x4f   :  { %2109 = vmatpush1.bf16.msra.mxu0 %v2108_v9  ;;  %v2142_v18 = vpack.c.bf16 %v102_v16, %v98_v15  ;;  %v99_v20 = vld [vmem:[#allocation6 + $0x60] sm:$0xff]  ;;  %v101_v23 = vld [vmem:[#allocation6 + $0x70] sm:$0xff]  ;;  %v104_v24 = vld [vmem:[#allocation6 + $0x88] sm:$0xff] }
  0x50   :  { %2141 = vmatpush1.bf16.msra.mxu1 %v2140_v13  ;;  %v2112_v22 = vpack.c.bf16 %v99_v20, %v95_v19  ;;  %v108_v25 = vld [vmem:[#allocation6 + $0xa8] sm:$0xff]  ;;  %2111 = vmatprep.subr.bf16.mxu0 %v2110_v17  ;;  %v2144_v26 = vpack.c.bf16 %v101_v23, %v97_v21  ;;  %v106_v28 = vld [vmem:[#allocation6 + $0x98] sm:$0xff]  ;;  %v103_v30 = vld [vmem:[#allocation6 + $0x80] sm:$0xff]  ;;  %p3005_p7 = por %p3004_p6, %p3003_p5 }
  0x51   :  { %2143 = vmatprep.subr.bf16.mxu1 %v2142_v18  ;;  %v2114_v27 = vpack.c.bf16 %v108_v25, %v104_v24  ;;  %v110_v29 = vld [vmem:[#allocation6 + $0xb8] sm:$0xff]  ;;  %v107_v32 = vld [vmem:[#allocation6 + $0xa0] sm:$0xff]  ;;  %v105_v33 = vld [vmem:[#allocation6 + $0x90] sm:$0xff] }
  0x52   :  { %v2146_v31 = vpack.c.bf16 %v110_v29, %v106_v28  ;;  %v109_v34 = vld [vmem:[#allocation6 + $0xb0] sm:$0xff]  ;;  %v2116_v35 = vpack.c.bf16 %v107_v32, %v103_v30  ;;  %v112_v36 = vld [vmem:[#allocation6 + $0xc8] sm:$0xff]  ;;  %v114_v38 = vld [vmem:[#allocation6 + $0xd8] sm:$0xff]  ;;  %p3006_p8 = pnand %p3005_p7, %p2999_p4 }
  0x53   :  { %2113 = vmatpush1.bf16.msra.mxu0 %v2112_v22  ;;  %v116_v37 = vld [vmem:[#allocation6 + $0xe8] sm:$0xff]  ;;  %v2148_v39 = vpack.c.bf16 %v109_v34, %v105_v33  ;;  %v118_v41 = vld [vmem:[#allocation6 + $0xf8] sm:$0xff]  ;;  %v111_v42 = vld [vmem:[#allocation6 + $0xc0] sm:$0xff] }
  0x54   :  { %2145 = vmatpush1.bf16.msra.mxu1 %v2144_v26  ;;  %2115 = vmatprep.subr.bf16.mxu0 %v2114_v27  ;;  %v2118_v40 = vpack.c.bf16 %v116_v37, %v112_v36  ;;  %v115_v43 = vld [vmem:[#allocation6 + $0xe0] sm:$0xff]  ;;  %v2150_v44 = vpack.c.bf16 %v118_v41, %v114_v38  ;;  %v113_v45 = vld [vmem:[#allocation6 + $0xd0] sm:$0xff]  ;;  %v120_v47 = vld [vmem:[#allocation6 + $0x108] sm:$0xff] }
  0x55   :  { %2147 = vmatprep.subr.bf16.mxu1 %v2146_v31  ;;  %v117_v46 = vld [vmem:[#allocation6 + $0xf0] sm:$0xff]  ;;  %v124_v48 = vld [vmem:[#allocation6 + $0x128] sm:$0xff]  ;;  %v122_v49 = vld [vmem:[#allocation6 + $0x118] sm:$0xff]  ;;  %v2120_v51 = vpack.c.bf16 %v115_v43, %v111_v42 }
  0x56   :  { %v126_v50 = vld [vmem:[#allocation6 + $0x138] sm:$0xff]  ;;  %v2152_v52 = vpack.c.bf16 %v117_v46, %v113_v45  ;;  %v2122_v53 = vpack.c.bf16 %v124_v48, %v120_v47  ;;  %v119_v54 = vld [vmem:[#allocation6 + $0x100] sm:$0xff]  ;;  %v121_v56 = vld [vmem:[#allocation6 + $0x110] sm:$0xff] }
  0x57   :  { %2117 = vmatpush1.bf16.msra.mxu0 %v2116_v35  ;;  %v123_v55 = vld [vmem:[#allocation6 + $0x120] sm:$0xff]  ;;  %v2154_v57 = vpack.c.bf16 %v126_v50, %v122_v49  ;;  %v125_v58 = vld [vmem:[#allocation6 + $0x130] sm:$0xff]  ;;  %v128_v59 = vld [vmem:[#allocation6 + $0x148] sm:$0xff] }
  0x58   :  { %2149 = vmatpush1.bf16.msra.mxu1 %v2148_v39  ;;  %2119 = vmatprep.subr.bf16.mxu0 %v2118_v40  ;;  %v132_v60 = vld [vmem:[#allocation6 + $0x168] sm:$0xff]  ;;  %v130_v61 = vld [vmem:[#allocation6 + $0x158] sm:$0xff]  ;;  %v2124_v63 = vpack.c.bf16 %v123_v55, %v119_v54  ;;  %v2156_v1 = vpack.c.bf16 %v125_v58, %v121_v56  ;;  %v127_v3 = vld [vmem:[#allocation6 + $0x140] sm:$0xff] }
  0x59   :  { %2151 = vmatprep.subr.bf16.mxu1 %v2150_v44  ;;  %v134_v62 = vld [vmem:[#allocation6 + $0x178] sm:$0xff]  ;;  %v2126_v2 = vpack.c.bf16 %v132_v60, %v128_v59  ;;  %v131_v4 = vld [vmem:[#allocation6 + $0x160] sm:$0xff]  ;;  %v129_v5 = vld [vmem:[#allocation6 + $0x150] sm:$0xff] }
  0x5a   :  { %v2158_v6 = vpack.c.bf16 %v134_v62, %v130_v61  ;;  %v133_v7 = vld [vmem:[#allocation6 + $0x170] sm:$0xff]  ;;  %v136_v8 = vld [vmem:[#allocation6 + $0x188] sm:$0xff]  ;;  %v138_v10 = vld [vmem:[#allocation6 + $0x198] sm:$0xff]  ;;  %v2128_v12 = vpack.c.bf16 %v131_v4, %v127_v3 }
  0x5b   :  { %2121 = vmatpush1.bf16.msra.mxu0 %v2120_v51  ;;  %v140_v9 = vld [vmem:[#allocation6 + $0x1a8] sm:$0xff]  ;;  %v142_v11 = vld [vmem:[#allocation6 + $0x1b8] sm:$0xff]  ;;  %v2160_v13 = vpack.c.bf16 %v133_v7, %v129_v5  ;;  %v135_v15 = vld [vmem:[#allocation6 + $0x180] sm:$0xff] }
  0x5c   :  { %2153 = vmatpush1.bf16.msra.mxu1 %v2152_v52  ;;  %2123 = vmatprep.subr.bf16.mxu0 %v2122_v53  ;;  %v2130_v14 = vpack.c.bf16 %v140_v9, %v136_v8  ;;  %v139_v16 = vld [vmem:[#allocation6 + $0x1a0] sm:$0xff]  ;;  %v137_v17 = vld [vmem:[#allocation6 + $0x190] sm:$0xff]  ;;  %v2162_v18 = vpack.c.bf16 %v142_v11, %v138_v10  ;;  %v144_v20 = vld [vmem:[#allocation6 + $0x1c8] sm:$0xff] }
  0x5d   :  { %2155 = vmatprep.subr.bf16.mxu1 %v2154_v57  ;;  %v141_v19 = vld [vmem:[#allocation6 + $0x1b0] sm:$0xff]  ;;  %v148_v21 = vld [vmem:[#allocation6 + $0x1e8] sm:$0xff]  ;;  %v146_v22 = vld [vmem:[#allocation6 + $0x1d8] sm:$0xff]  ;;  %v2132_v24 = vpack.c.bf16 %v139_v16, %v135_v15 }
  0x5e   :  { %v150_v23 = vld [vmem:[#allocation6 + $0x1f8] sm:$0xff]  ;;  %v2164_v25 = vpack.c.bf16 %v141_v19, %v137_v17  ;;  %v2134_v26 = vpack.c.bf16 %v148_v21, %v144_v20  ;;  %v143_v27 = vld [vmem:[#allocation6 + $0x1c0] sm:$0xff]  ;;  %v145_v29 = vld [vmem:[#allocation6 + $0x1d0] sm:$0xff] }
  0x5f   :  { %2125 = vmatpush1.bf16.msra.mxu0 %v2124_v63  ;;  %v147_v28 = vld [vmem:[#allocation6 + $0x1e0] sm:$0xff]  ;;  %v2166_v30 = vpack.c.bf16 %v150_v23, %v146_v22  ;;  %v149_v31 = vld [vmem:[#allocation6 + $0x1f0] sm:$0xff]  ;;  %v432_v32 = vld [vmem:[#allocation8 + $0x8] sm:$0xff] }
  0x60   :  { %2157 = vmatpush1.bf16.msra.mxu1 %v2156_v1  ;;  %2127 = vmatprep.subr.bf16.mxu0 %v2126_v2  ;;  %v436_v33 = vld [vmem:[#allocation8 + $0x28] sm:$0xff]  ;;  %v434_v34 = vld [vmem:[#allocation8 + $0x18] sm:$0xff]  ;;  %v2136_v36 = vpack.c.bf16 %v147_v28, %v143_v27  ;;  %v2168_v37 = vpack.c.bf16 %v149_v31, %v145_v29  ;;  %v431_v39 = vld [vmem:[#allocation8] sm:$0xff] }
  0x61   :  { %2159 = vmatprep.subr.bf16.mxu1 %v2158_v6  ;;  %v438_v35 = vld [vmem:[#allocation8 + $0x38] sm:$0xff]  ;;  %v3144_v38 = vpack.c.bf16 %v436_v33, %v432_v32  ;;  %v435_v40 = vld [vmem:[#allocation8 + $0x20] sm:$0xff]  ;;  %v433_v42 = vld [vmem:[#allocation8 + $0x10] sm:$0xff] }
  0x62   :  { %v3146_v41 = vpack.c.bf16 %v438_v35, %v434_v34  ;;  %v437_v43 = vld [vmem:[#allocation8 + $0x30] sm:$0xff]  ;;  %v440_v44 = vld [vmem:[#allocation8 + $0x48] sm:$0xff]  ;;  %v79_v46 = vld [vmem:[#allocation3] sm:$0xff]  ;;  %v3148_v47 = vpack.c.bf16 %v435_v40, %v431_v39 }
  0x63   :  { %2129 = vmatpush1.bf16.msra.mxu0 %v2128_v12  ;;  %v444_v45 = vld [vmem:[#allocation8 + $0x68] sm:$0xff]  ;;  %v442_v48 = vld [vmem:[#allocation8 + $0x58] sm:$0xff]  ;;  %v3151_v50 = vpack.c.bf16 %v437_v43, %v433_v42  ;;  %v439_v51 = vld [vmem:[#allocation8 + $0x40] sm:$0xff] }
  0x64   :  { %2161 = vmatpush1.bf16.msra.mxu1 %v2160_v13  ;;  %2131 = vmatprep.subr.bf16.mxu0 %v2130_v14  ;;  %v446_v49 = vld [vmem:[#allocation8 + $0x78] sm:$0xff]  ;;  %v443_v52 = vld [vmem:[#allocation8 + $0x60] sm:$0xff]  ;;  %v3154_v53 = vpack.c.bf16 %v444_v45, %v440_v44  ;;  %v441_v54 = vld [vmem:[#allocation8 + $0x50] sm:$0xff] }
  0x65   :  { %2163 = vmatprep.subr.bf16.mxu1 %v2162_v18  ;;  %v445_v55 = vld [vmem:[#allocation8 + $0x70] sm:$0xff]  ;;  %v3156_v56 = vpack.c.bf16 %v446_v49, %v442_v48  ;;  %v448_v57 = vld [vmem:[#allocation8 + $0x88] sm:$0xff]  ;;  %v3159_v60 = vpack.c.bf16 %v443_v52, %v439_v51  ;;  %v450_v61 = vld [vmem:[#allocation8 + $0x98] sm:$0xff] }
  0x66   :  { %v452_v58 = vld [vmem:[#allocation8 + $0xa8] sm:$0xff]  ;;  %v454_v62 = vld [vmem:[#allocation8 + $0xb8] sm:$0xff]  ;;  %v3163_v63 = vpack.c.bf16 %v445_v55, %v441_v54  ;;  %v447_v1 = vld [vmem:[#allocation8 + $0x80] sm:$0xff] }
  0x67   :  { %2133 = vmatpush1.bf16.msra.mxu0 %v2132_v24  ;;  %v80_v59 = vld [vmem:[#allocation3 + $0x8] sm:$0xff]  ;;  %v451_v2 = vld [vmem:[#allocation8 + $0xa0] sm:$0xff]  ;;  %v3167_v3 = vpack.c.bf16 %v452_v58, %v448_v57  ;;  %v449_v4 = vld [vmem:[#allocation8 + $0x90] sm:$0xff]  ;;  %v3170_v6 = vpack.c.bf16 %v454_v62, %v450_v61 }
  0x68   :  { %2165 = vmatpush1.bf16.msra.mxu1 %v2164_v25  ;;  %2135 = vmatprep.subr.bf16.mxu0 %v2134_v26  ;;  %v453_v5 = vld [vmem:[#allocation8 + $0xb0] sm:$0xff]  ;;  %v456_v7 = vld [vmem:[#allocation8 + $0xc8] sm:$0xff]  ;;  %v3173_v10 = vpack.c.bf16 %v451_v2, %v447_v1  ;;  %v458_v11 = vld [vmem:[#allocation8 + $0xd8] sm:$0xff] }
  0x69   :  { %2167 = vmatprep.subr.bf16.mxu1 %v2166_v30  ;;  %v460_v8 = vld [vmem:[#allocation8 + $0xe8] sm:$0xff]  ;;  %v81_v9 = vld [vmem:[#allocation3 + $0x10] sm:$0xff]  ;;  %v462_v12 = vld [vmem:[#allocation8 + $0xf8] sm:$0xff]  ;;  %v3177_v13 = vpack.c.bf16 %v453_v5, %v449_v4 }
  0x6a   :  { %v455_v14 = vld [vmem:[#allocation8 + $0xc0] sm:$0xff]  ;;  %v3181_v16 = vpack.c.bf16 %v460_v8, %v456_v7  ;;  %v457_v17 = vld [vmem:[#allocation8 + $0xd0] sm:$0xff]  ;;  %v3184_v19 = vpack.c.bf16 %v462_v12, %v458_v11  ;;  %v464_v20 = vld [vmem:[#allocation8 + $0x108] sm:$0xff] }
  0x6b   :  { %2137 = vmatpush1.bf16.msra.mxu0 %v2136_v36  ;;  %v459_v15 = vld [vmem:[#allocation8 + $0xe0] sm:$0xff]  ;;  %v461_v18 = vld [vmem:[#allocation8 + $0xf0] sm:$0xff]  ;;  %v468_v21 = vld [vmem:[#allocation8 + $0x128] sm:$0xff] }
  0x6c   :  { %2169 = vmatpush1.bf16.msra.mxu1 %v2168_v37  ;;  %2171 = vmatprep.subr.bf16.mxu0 %v3144_v38  ;;  %v82_v22 = vld [vmem:[#allocation3 + $0x18] sm:$0xff]  ;;  %v3187_v23 = vpack.c.bf16 %v459_v15, %v455_v14  ;;  %v3191_v26 = vpack.c.bf16 %v461_v18, %v457_v17  ;;  %v463_v27 = vld [vmem:[#allocation8 + $0x100] sm:$0xff]  ;;  %v3195_v29 = vpack.c.bf16 %v468_v21, %v464_v20  ;;  %v465_v30 = vld [vmem:[#allocation8 + $0x110] sm:$0xff] }
  0x6d   :  { %2203 = vmatprep.subr.bf16.mxu1 %v3146_v41  ;;  %v466_v24 = vld [vmem:[#allocation8 + $0x118] sm:$0xff]  ;;  %v467_v28 = vld [vmem:[#allocation8 + $0x120] sm:$0xff]  ;;  %v469_v31 = vld [vmem:[#allocation8 + $0x130] sm:$0xff] }
  0x6e   :  { %238 = vmatmul.mubr.f32.vlgmr.msra.gmra.mrb[0].mxu0 %v79_v46  ;;  %v470_v25 = vld [vmem:[#allocation8 + $0x138] sm:$0xff]  ;;  %v472_v33 = vld [vmem:[#allocation8 + $0x148] sm:$0xff]  ;;  %v83_v35 = vld [vmem:[#allocation3 + $0x20] sm:$0xff]  ;;  %v3201_v36 = vpack.c.bf16 %v467_v28, %v463_v27  ;;  %v3205_v40 = vpack.c.bf16 %v469_v31, %v465_v30  ;;  %v153_v28 = vlaneseq }
  0x6f   :  { %351 = vmatmul.mubr.f32.vlgmr.msra.gmra.mrb[0].mxu1 %v79_v46  ;;  %2173 = vmatpush1.bf16.msra.mxu0 %v3148_v47  ;;  %v3198_v32 = vpack.c.bf16 %v470_v25, %v466_v24  ;;  %v476_v34 = vld [vmem:[#allocation8 + $0x168] sm:$0xff]  ;;  %v474_v37 = vld [vmem:[#allocation8 + $0x158] sm:$0xff]  ;;  %v471_v42 = vld [vmem:[#allocation8 + $0x140] sm:$0xff] }
  0x70   :  { %2205 = vmatpush1.bf16.msra.mxu1 %v3151_v50  ;;  %243 = vmatprep.mubr.f32.mxu0 %v3036_v0  ;;  %v478_v39 = vld [vmem:[#allocation8 + $0x178] sm:$0xff]  ;;  %v475_v43 = vld [vmem:[#allocation8 + $0x160] sm:$0xff]  ;;  %v3209_v44 = vpack.c.bf16 %v476_v34, %v472_v33  ;;  %v473_v45 = vld [vmem:[#allocation8 + $0x150] sm:$0xff]  ;;  %v154_v30 = vshrl.u32 %v153_v28, 7 }
  0x71   :  { %356 = vmatprep.mubr.f32.mxu1 %v3036_v0  ;;  %2175 = vmatprep.subr.bf16.mxu0 %v3154_v53  ;;  %v477_v46 = vld [vmem:[#allocation8 + $0x170] sm:$0xff]  ;;  %v3212_v48 = vpack.c.bf16 %v478_v39, %v474_v37  ;;  %v480_v49 = vld [vmem:[#allocation8 + $0x188] sm:$0xff]  ;;  %v3215_v54 = vpack.c.bf16 %v475_v43, %v471_v42  ;;  %v482_v55 = vld [vmem:[#allocation8 + $0x198] sm:$0xff] }
  0x72   :  { %244 = vmatmul.mubr.f32.gmra.mrb[2].mxu0 %v80_v59  ;;  %2207 = vmatprep.subr.bf16.mxu1 %v3156_v56  ;;  %v484_v51 = vld [vmem:[#allocation8 + $0x1a8] sm:$0xff]  ;;  %v486_v57 = vld [vmem:[#allocation8 + $0x1b8] sm:$0xff]  ;;  %v3219_v58 = vpack.c.bf16 %v477_v46, %v473_v45  ;;  %v483_v61 = vld [vmem:[#allocation8 + $0x1a0] sm:$0xff]  ;;  %v155_v31 = vsub.s32 0, %v154_v30  ;;  %v159_v34 = vsub.s32 1, %v154_v30  ;;  %v167_v42 = vsub.s32 3, %v154_v30 }
  0x73   :  { %357 = vmatmul.mubr.f32.gmra.mrb[2].mxu1 %v80_v59  ;;  %2177 = vmatpush1.bf16.msra.mxu0 %v3159_v60  ;;  %v84_v52 = vld [vmem:[#allocation3 + $0x28] sm:$0xff]  ;;  %v479_v59 = vld [vmem:[#allocation8 + $0x180] sm:$0xff]  ;;  %v3223_v62 = vpack.c.bf16 %v484_v51, %v480_v49  ;;  %v481_v1 = vld [vmem:[#allocation8 + $0x190] sm:$0xff]  ;;  %v3226_v4 = vpack.c.bf16 %v486_v57, %v482_v55 }
  0x74   :  { %2209 = vmatpush1.bf16.msra.mxu1 %v3163_v63  ;;  %249 = vmatprep.mubr.f32.mxu0 %v3036_v0  ;;  %v485_v2 = vld [vmem:[#allocation8 + $0x1b0] sm:$0xff]  ;;  %v488_v5 = vld [vmem:[#allocation8 + $0x1c8] sm:$0xff]  ;;  %v490_v11 = vld [vmem:[#allocation8 + $0x1d8] sm:$0xff] }
  0x75   :  { %362 = vmatprep.mubr.f32.mxu1 %v3036_v0  ;;  %2179 = vmatprep.subr.bf16.mxu0 %v3167_v3  ;;  %v492_v7 = vld [vmem:[#allocation8 + $0x1e8] sm:$0xff]  ;;  %v85_v8 = vld [vmem:[#allocation3 + $0x30] sm:$0xff]  ;;  %v494_v12 = vld [vmem:[#allocation8 + $0x1f8] sm:$0xff]  ;;  %v3233_v14 = vpack.c.bf16 %v485_v2, %v481_v1 }
  0x76   :  { %250 = vmatmul.mubr.f32.gmra.mrb[4].mxu0 %v81_v9  ;;  %2211 = vmatprep.subr.bf16.mxu1 %v3170_v6  ;;  %v487_v15 = vld [vmem:[#allocation8 + $0x1c0] sm:$0xff]  ;;  %v3237_v18 = vpack.c.bf16 %v492_v7, %v488_v5  ;;  %v489_v20 = vld [vmem:[#allocation8 + $0x1d0] sm:$0xff]  ;;  %v86_v24 = vld [vmem:[#allocation3 + $0x38] sm:$0xff] }
  0x77   :  { %363 = vmatmul.mubr.f32.gmra.mrb[4].mxu1 %v81_v9  ;;  %2181 = vmatpush1.bf16.msra.mxu0 %v3173_v10  ;;  %v3229_v9 = vpack.c.bf16 %v483_v61, %v479_v59  ;;  %v491_v17 = vld [vmem:[#allocation8 + $0x1e0] sm:$0xff]  ;;  %v493_v21 = vld [vmem:[#allocation8 + $0x1f0] sm:$0xff]  ;;  %v163_v59 = vsub.s32 2, %v154_v30 }
  0x78   :  { %2213 = vmatpush1.bf16.msra.mxu1 %v3177_v13  ;;  %255 = vmatprep.mubr.f32.mxu0 %v3036_v0  ;;  %v3243_v25 = vpack.c.bf16 %v491_v17, %v487_v15  ;;  %v3247_v27 = vpack.c.bf16 %v493_v21, %v489_v20  ;;  %v151_v33 = vld [vmem:[%s3586_s3] sm:$0xf] }
  0x79   :  { %368 = vmatprep.mubr.f32.mxu1 %v3036_v0  ;;  %2183 = vmatprep.subr.bf16.mxu0 %v3181_v16  ;;  %v3299_v37 = vrot.slane %v151_v33, %v159_v34  ;;  %v3303_v57 = vrot.slane %v151_v33, %v167_v42  ;;  %v3306_v1 = vrot.slane %v151_v33, %v163_v59 }
  0x7a   :  { %256 = vmatmul.mubr.f32.gmra.mrb[6].mxu0 %v82_v22  ;;  %2215 = vmatprep.subr.bf16.mxu1 %v3184_v19 }
  0x7b   :  { %369 = vmatmul.mubr.f32.gmra.mrb[6].mxu1 %v82_v22  ;;  %2185 = vmatpush1.bf16.msra.mxu0 %v3187_v23  ;;  %v3240_v22 = vpack.c.bf16 %v494_v12, %v490_v11 }
  0x7c   :  { %2217 = vmatpush1.bf16.msra.mxu1 %v3191_v26  ;;  %261 = vmatprep.mubr.f32.mxu0 %v3036_v0 }
  0x7d   :  { %374 = vmatprep.mubr.f32.mxu1 %v3036_v0  ;;  %2187 = vmatprep.subr.bf16.mxu0 %v3195_v29 }
  0x7e   :  { %262 = vmatmul.mubr.f32.gmra.mrb[8].mxu0 %v83_v35  ;;  %2219 = vmatprep.subr.bf16.mxu1 %v3198_v32 }
  0x7f   :  { %375 = vmatmul.mubr.f32.gmra.mrb[8].mxu1 %v83_v35  ;;  %2189 = vmatpush1.bf16.msra.mxu0 %v3201_v36  ;;  %v3297_v35 = vrot.slane %v151_v33, %v155_v31 }
  0x80   :  { %2221 = vmatpush1.bf16.msra.mxu1 %v3205_v40  ;;  %267 = vmatprep.mubr.f32.mxu0 %v3036_v0 }
  0x81   :  { %380 = vmatprep.mubr.f32.mxu1 %v3036_v0  ;;  %2191 = vmatprep.subr.bf16.mxu0 %v3209_v44 }
  0x82   :  { %268 = vmatmul.mubr.f32.gmra.mrb[10].mxu0 %v84_v52  ;;  %2223 = vmatprep.subr.bf16.mxu1 %v3212_v48 }
  0x83   :  { %381 = vmatmul.mubr.f32.gmra.mrb[10].mxu1 %v84_v52  ;;  %2193 = vmatpush1.bf16.msra.mxu0 %v3215_v54 }
  0x84   :  { %2225 = vmatpush1.bf16.msra.mxu1 %v3219_v58  ;;  %273 = vmatprep.mubr.f32.mxu0 %v3036_v0 }
  0x85   :  { %386 = vmatprep.mubr.f32.mxu1 %v3036_v0  ;;  %2195 = vmatprep.subr.bf16.mxu0 %v3223_v62 }
  0x86   :  { %274 = vmatmul.mubr.f32.gmra.mrb[12].mxu0 %v85_v8  ;;  %2227 = vmatprep.subr.bf16.mxu1 %v3226_v4 }
  0x87   :  { %387 = vmatmul.mubr.f32.gmra.mrb[12].mxu1 %v85_v8  ;;  %2197 = vmatpush1.bf16.msra.mxu0 %v3229_v9 }
  0x88   :  { %2229 = vmatpush1.bf16.msra.mxu1 %v3233_v14  ;;  %279 = vmatprep.mubr.f32.mxu0 %v3036_v0 }
  0x89   :  { %392 = vmatprep.mubr.f32.mxu1 %v3036_v0  ;;  %2199 = vmatprep.subr.bf16.mxu0 %v3237_v18 }
  0x8a   :  { %280 = vmatmul.mubr.f32.gmra.mrb[14].mxu0 %v86_v24  ;;  %2231 = vmatprep.subr.bf16.mxu1 %v3240_v22 }
  0x8b   :  { %393 = vmatmul.mubr.f32.gmra.mrb[14].mxu1 %v86_v24  ;;  %2201 = vmatpush1.bf16.msra.mxu0 %v3243_v25 }
  0x8c   :  { %2233 = vmatpush1.bf16.msra.mxu1 %v3247_v27  ;;  %566 = vmatprep.mubr.f32.mxu0 %v3036_v0 }
  0x8d   :  { %637 = vmatprep.mubr.f32.mxu1 %v3036_v0  ;;  %2235 = vmatprep.subr.bf16.mxu0 %v3144_v38 }
  0x8e   :  { %567 = vmatmul.mubr.f32.vlgmr.msra.gmra.mrb[0].mxu0 %v3036_v0  ;;  %2267 = vmatprep.subr.bf16.mxu1 %v3146_v41 }
  0x8f   :  { %638 = vmatmul.mubr.f32.vlgmr.msra.gmra.mrb[0].mxu1 %v3036_v0  ;;  %2237 = vmatpush1.bf16.msra.mxu0 %v3148_v47 }
  0x90   :  { %2269 = vmatpush1.bf16.msra.mxu1 %v3151_v50  ;;  %2239 = vmatprep.subr.bf16.mxu0 %v3154_v53 }
  0x91   :  { %2271 = vmatprep.subr.bf16.mxu1 %v3156_v56  ;;  %743 = vmatprep.mubr.f32.mxu0 %v3036_v0 }
  0x92   :  { %814 = vmatprep.mubr.f32.mxu1 %v3036_v0 }
  0x93   :  { %2241 = vmatpush1.bf16.msra.mxu0 %v3159_v60 }
  0x94   :  { %2273 = vmatpush1.bf16.msra.mxu1 %v3163_v63  ;;  %2243 = vmatprep.subr.bf16.mxu0 %v3167_v3 }
  0x95   :  { %2275 = vmatprep.subr.bf16.mxu1 %v3170_v6 }
  0x97   :  { %2245 = vmatpush1.bf16.msra.mxu0 %v3173_v10 }
  0x98   :  { %2277 = vmatpush1.bf16.msra.mxu1 %v3177_v13  ;;  %2247 = vmatprep.subr.bf16.mxu0 %v3181_v16 }
  0x99   :  { %2279 = vmatprep.subr.bf16.mxu1 %v3184_v19 }
  0x9b   :  { %2249 = vmatpush1.bf16.msra.mxu0 %v3187_v23 }
  0x9c   :  { %2281 = vmatpush1.bf16.msra.mxu1 %v3191_v26  ;;  %2251 = vmatprep.subr.bf16.mxu0 %v3195_v29 }
  0x9d   :  { %2283 = vmatprep.subr.bf16.mxu1 %v3198_v32 }
  0x9f   :  { %2253 = vmatpush1.bf16.msra.mxu0 %v3201_v36 }
  0xa0   :  { %2285 = vmatpush1.bf16.msra.mxu1 %v3205_v40  ;;  %2255 = vmatprep.subr.bf16.mxu0 %v3209_v44 }
  0xa1   :  { %2287 = vmatprep.subr.bf16.mxu1 %v3212_v48 }
  0xa3   :  { %2257 = vmatpush1.bf16.msra.mxu0 %v3215_v54 }
  0xa4   :  { %2289 = vmatpush1.bf16.msra.mxu1 %v3219_v58  ;;  %2259 = vmatprep.subr.bf16.mxu0 %v3223_v62 }
  0xa5   :  { %2291 = vmatprep.subr.bf16.mxu1 %v3226_v4 }
  0xa7   :  { %2261 = vmatpush1.bf16.msra.mxu0 %v3229_v9 }
  0xa8   :  { %2293 = vmatpush1.bf16.msra.mxu1 %v3233_v14  ;;  %2263 = vmatprep.subr.bf16.mxu0 %v3237_v18 }
  0xa9   :  { %2295 = vmatprep.subr.bf16.mxu1 %v3240_v22 }
  0xab   :  { %2265 = vmatpush1.bf16.msra.mxu0 %v3243_v25 }
  0xac   :  { %2297 = vmatpush1.bf16.msra.mxu1 %v3247_v27  ;;  %2299 = vmatprep.subr.bf16.mxu0 %v3144_v38 }
  0xad   :  { %2331 = vmatprep.subr.bf16.mxu1 %v3146_v41 }
 0x161   :  { %v568_v39 = vpop.f32.mrb[0].mxu0 }
 0x162   :  { %v2706_v43 = vadd.f32 %v568_v39, %v3297_v35  ;;  %v639_v45 = vpop.f32.mrb[0].mxu1  ;;  %v570_v46 = vpop.f32.mrb[1].mxu0 }
 0x163   :  { %v2707_v49 = vadd.f32 %v570_v46, %v3299_v37  ;;  %v641_v51 = vpop.f32.mrb[1].mxu1  ;;  %v2722_v5 = vadd.f32 %v639_v45, %v3306_v1 }
 0x164   :  { %v2029_v52 = vmul.f32 -1.442695, %v2706_v43  ;;  %v2723_v61 = vadd.f32 %v641_v51, %v3303_v57 }
 0x165   :  { %v2030_v55 = vmul.f32 -1.442695, %v2707_v49 }
 0x166   :  { %2782 = vpow2.f32 %v2029_v52  ;;  %v2031_v2 = vmul.f32 -1.442695, %v2723_v61 }
 0x167   :  { %2784 = vpow2.f32 %v2030_v55 }
 0x168   :  { %2786 = vpow2.f32 %v2031_v2 }
 0x169   :  { %2788 = vtanh.f32 %v2722_v5 }
 0x170   :  { %v2783_v7 = vpop.eup %2782 }
 0x171   :  { %v2785_v8 = vpop.eup %2784  ;;  %v651_v11 = vadd.f32 1.0, %v2783_v7 }
 0x172   :  { %v657_v12 = vadd.f32 1.0, %v2785_v8  ;;  %v2787_v15 = vpop.eup %2786 }
 0x173   :  { %2790 = vrcp.f32 %v651_v11  ;;  %v2789_v17 = vpop.eup %2788  ;;  %v664_v28 = vadd.f32 1.0, %v2787_v15 }
 0x174   :  { %2792 = vrcp.f32 %v657_v12 }
 0x175   :  { %2794 = vrcp.f32 %v664_v28 }
 0x17d   :  { %v2791_v20 = vpop.eup %2790 }
 0x17e   :  { %v2793_v21 = vpop.eup %2792  ;;  %v668_v24 = vmul.f32 %v2791_v20, %v2789_v17 }
 0x17f   :  { %v667_v30 = vmul.f32 0.0, %v2793_v21  ;;  %v2795_v33 = vpop.eup %2794 }
 0x181   :  { %v3309_v31 = vadd.f32 %v668_v24, %v667_v30 }
 0x183   :  { %2796 = vtanh.f32 %v3309_v31 }
 0x18d   :  { %v2797_v34 = vpop.eup %2796 }
 0x18e   :  { %v671_v39 = vmul.f32 %v2797_v34, %v2795_v33 }
 0x190   :  { %744 = vmatmul.mubr.f32.vlgmr.msra.gmra.mrb[2].mxu0 %v671_v39  ;;  %815 = vmatmul.mubr.f32.vlgmr.msra.gmra.mrb[2].mxu1 %v671_v39 }
 0x191   :  { %2301 = vmatpush1.bf16.msra.mxu0 %v3148_v47  ;;  %2333 = vmatpush1.bf16.msra.mxu1 %v3151_v50 }
 0x192   :  { %2303 = vmatprep.subr.bf16.mxu0 %v3154_v53  ;;  %2335 = vmatprep.subr.bf16.mxu1 %v3156_v56 }
 0x193   :  { %920 = vmatprep.mubr.f32.mxu0 %v3036_v0  ;;  %991 = vmatprep.mubr.f32.mxu1 %v3036_v0 }
 0x195   :  { %2305 = vmatpush1.bf16.msra.mxu0 %v3159_v60  ;;  %2337 = vmatpush1.bf16.msra.mxu1 %v3163_v63 }
 0x196   :  { %2307 = vmatprep.subr.bf16.mxu0 %v3167_v3  ;;  %2339 = vmatprep.subr.bf16.mxu1 %v3170_v6 }
 0x199   :  { %2309 = vmatpush1.bf16.msra.mxu0 %v3173_v10  ;;  %2341 = vmatpush1.bf16.msra.mxu1 %v3177_v13 }
 0x19a   :  { %2311 = vmatprep.subr.bf16.mxu0 %v3181_v16  ;;  %2343 = vmatprep.subr.bf16.mxu1 %v3184_v19 }
 0x19d   :  { %2313 = vmatpush1.bf16.msra.mxu0 %v3187_v23  ;;  %2345 = vmatpush1.bf16.msra.mxu1 %v3191_v26 }
 0x19e   :  { %2315 = vmatprep.subr.bf16.mxu0 %v3195_v29  ;;  %2347 = vmatprep.subr.bf16.mxu1 %v3198_v32 }
 0x1a1   :  { %2317 = vmatpush1.bf16.msra.mxu0 %v3201_v36  ;;  %2349 = vmatpush1.bf16.msra.mxu1 %v3205_v40 }
 0x1a2   :  { %2319 = vmatprep.subr.bf16.mxu0 %v3209_v44  ;;  %2351 = vmatprep.subr.bf16.mxu1 %v3212_v48 }
 0x1a5   :  { %2321 = vmatpush1.bf16.msra.mxu0 %v3215_v54  ;;  %2353 = vmatpush1.bf16.msra.mxu1 %v3219_v58 }
 0x1a6   :  { %2323 = vmatprep.subr.bf16.mxu0 %v3223_v62  ;;  %2355 = vmatprep.subr.bf16.mxu1 %v3226_v4 }
 0x1a9   :  { %2325 = vmatpush1.bf16.msra.mxu0 %v3229_v9  ;;  %2357 = vmatpush1.bf16.msra.mxu1 %v3233_v14 }
 0x1aa   :  { %2327 = vmatprep.subr.bf16.mxu0 %v3237_v18  ;;  %2359 = vmatprep.subr.bf16.mxu1 %v3240_v22 }
 0x1ad   :  { %2329 = vmatpush1.bf16.msra.mxu0 %v3243_v25  ;;  %2361 = vmatpush1.bf16.msra.mxu1 %v3247_v27 }
 0x1ae   :  { %2363 = vmatprep.subr.bf16.mxu0 %v3144_v38  ;;  %2395 = vmatprep.subr.bf16.mxu1 %v3146_v41 }
 0x263   :  { %v745_v42 = vpop.f32.mrb[2].mxu0  ;;  %v816_v43 = vpop.f32.mrb[2].mxu1 }
 0x264   :  { %v2708_v45 = vadd.f32 %v745_v42, %v3297_v35  ;;  %v747_v46 = vpop.f32.mrb[3].mxu0  ;;  %v818_v49 = vpop.f32.mrb[3].mxu1  ;;  %v2724_v2 = vadd.f32 %v816_v43, %v3306_v1 }
 0x265   :  { %v2709_v51 = vadd.f32 %v747_v46, %v3299_v37  ;;  %v2725_v59 = vadd.f32 %v818_v49, %v3303_v57 }
 0x266   :  { %v2032_v52 = vmul.f32 -1.442695, %v2708_v45 }
 0x267   :  { %v2033_v55 = vmul.f32 -1.442695, %v2709_v51  ;;  %v2034_v61 = vmul.f32 -1.442695, %v2725_v59 }
 0x268   :  { %2798 = vpow2.f32 %v2032_v52 }
 0x269   :  { %2800 = vpow2.f32 %v2033_v55 }
 0x26a   :  { %2802 = vpow2.f32 %v2034_v61 }
 0x26b   :  { %2804 = vtanh.f32 %v2724_v2 }
 0x272   :  { %v2799_v5 = vpop.eup %2798 }
 0x273   :  { %v2801_v7 = vpop.eup %2800  ;;  %v828_v8 = vadd.f32 1.0, %v2799_v5 }
 0x274   :  { %v834_v11 = vadd.f32 1.0, %v2801_v7  ;;  %v2803_v12 = vpop.eup %2802 }
 0x275   :  { %2806 = vrcp.f32 %v828_v8  ;;  %v2805_v15 = vpop.eup %2804  ;;  %v841_v24 = vadd.f32 1.0, %v2803_v12 }
 0x276   :  { %2808 = vrcp.f32 %v834_v11 }
 0x277   :  { %2810 = vrcp.f32 %v841_v24 }
 0x27f   :  { %v2807_v17 = vpop.eup %2806 }
 0x280   :  { %v2809_v20 = vpop.eup %2808  ;;  %v845_v21 = vmul.f32 %v2807_v17, %v2805_v15 }
 0x281   :  { %v844_v28 = vmul.f32 %v2809_v20, %v3309_v31  ;;  %v2811_v33 = vpop.eup %2810 }
 0x283   :  { %v3351_v30 = vadd.f32 %v845_v21, %v844_v28 }
 0x285   :  { %2812 = vtanh.f32 %v3351_v30 }
 0x28f   :  { %v2813_v34 = vpop.eup %2812 }
 0x290   :  { %v848_v39 = vmul.f32 %v2813_v34, %v2811_v33 }
 0x292   :  { %921 = vmatmul.mubr.f32.vlgmr.msra.gmra.mrb[4].mxu0 %v848_v39  ;;  %992 = vmatmul.mubr.f32.vlgmr.msra.gmra.mrb[4].mxu1 %v848_v39 }
 0x293   :  { %2365 = vmatpush1.bf16.msra.mxu0 %v3148_v47  ;;  %2397 = vmatpush1.bf16.msra.mxu1 %v3151_v50 }
 0x294   :  { %2367 = vmatprep.subr.bf16.mxu0 %v3154_v53  ;;  %2399 = vmatprep.subr.bf16.mxu1 %v3156_v56 }
 0x295   :  { %1097 = vmatprep.mubr.f32.mxu0 %v3036_v0  ;;  %1168 = vmatprep.mubr.f32.mxu1 %v3036_v0 }
 0x297   :  { %2369 = vmatpush1.bf16.msra.mxu0 %v3159_v60  ;;  %2401 = vmatpush1.bf16.msra.mxu1 %v3163_v63 }
 0x298   :  { %2371 = vmatprep.subr.bf16.mxu0 %v3167_v3  ;;  %2403 = vmatprep.subr.bf16.mxu1 %v3170_v6 }
 0x29b   :  { %2373 = vmatpush1.bf16.msra.mxu0 %v3173_v10  ;;  %2405 = vmatpush1.bf16.msra.mxu1 %v3177_v13 }
 0x29c   :  { %2375 = vmatprep.subr.bf16.mxu0 %v3181_v16  ;;  %2407 = vmatprep.subr.bf16.mxu1 %v3184_v19 }
 0x29f   :  { %2377 = vmatpush1.bf16.msra.mxu0 %v3187_v23  ;;  %2409 = vmatpush1.bf16.msra.mxu1 %v3191_v26 }
 0x2a0   :  { %2379 = vmatprep.subr.bf16.mxu0 %v3195_v29  ;;  %2411 = vmatprep.subr.bf16.mxu1 %v3198_v32 }
 0x2a3   :  { %2381 = vmatpush1.bf16.msra.mxu0 %v3201_v36  ;;  %2413 = vmatpush1.bf16.msra.mxu1 %v3205_v40 }
 0x2a4   :  { %2383 = vmatprep.subr.bf16.mxu0 %v3209_v44  ;;  %2415 = vmatprep.subr.bf16.mxu1 %v3212_v48 }
 0x2a7   :  { %2385 = vmatpush1.bf16.msra.mxu0 %v3215_v54  ;;  %2417 = vmatpush1.bf16.msra.mxu1 %v3219_v58 }
 0x2a8   :  { %2387 = vmatprep.subr.bf16.mxu0 %v3223_v62  ;;  %2419 = vmatprep.subr.bf16.mxu1 %v3226_v4 }
 0x2ab   :  { %2389 = vmatpush1.bf16.msra.mxu0 %v3229_v9  ;;  %2421 = vmatpush1.bf16.msra.mxu1 %v3233_v14 }
 0x2ac   :  { %2391 = vmatprep.subr.bf16.mxu0 %v3237_v18  ;;  %2423 = vmatprep.subr.bf16.mxu1 %v3240_v22 }
 0x2af   :  { %2393 = vmatpush1.bf16.msra.mxu0 %v3243_v25  ;;  %2425 = vmatpush1.bf16.msra.mxu1 %v3247_v27 }
 0x2b0   :  { %2427 = vmatprep.subr.bf16.mxu0 %v3144_v38  ;;  %2459 = vmatprep.subr.bf16.mxu1 %v3146_v41 }
 0x365   :  { %v922_v31 = vpop.f32.mrb[4].mxu0  ;;  %v993_v42 = vpop.f32.mrb[4].mxu1 }
 0x366   :  { %v2710_v43 = vadd.f32 %v922_v31, %v3297_v35  ;;  %v924_v45 = vpop.f32.mrb[5].mxu0  ;;  %v995_v46 = vpop.f32.mrb[5].mxu1  ;;  %v2726_v61 = vadd.f32 %v993_v42, %v3306_v1 }
 0x367   :  { %v2711_v49 = vadd.f32 %v924_v45, %v3299_v37  ;;  %v2727_v55 = vadd.f32 %v995_v46, %v3303_v57 }
 0x368   :  { %v2035_v51 = vmul.f32 -1.442695, %v2710_v43 }
 0x369   :  { %v2036_v52 = vmul.f32 -1.442695, %v2711_v49  ;;  %v2037_v59 = vmul.f32 -1.442695, %v2727_v55 }
 0x36a   :  { %2814 = vpow2.f32 %v2035_v51 }
 0x36b   :  { %2816 = vpow2.f32 %v2036_v52 }
 0x36c   :  { %2818 = vpow2.f32 %v2037_v59 }
 0x36d   :  { %2820 = vtanh.f32 %v2726_v61 }
 0x374   :  { %v2815_v2 = vpop.eup %2814 }
 0x375   :  { %v2817_v5 = vpop.eup %2816  ;;  %v1005_v7 = vadd.f32 1.0, %v2815_v2 }
 0x376   :  { %v1011_v8 = vadd.f32 1.0, %v2817_v5  ;;  %v2819_v11 = vpop.eup %2818 }
 0x377   :  { %2822 = vrcp.f32 %v1005_v7  ;;  %v2821_v12 = vpop.eup %2820  ;;  %v1018_v21 = vadd.f32 1.0, %v2819_v11 }
 0x378   :  { %2824 = vrcp.f32 %v1011_v8 }
 0x379   :  { %2826 = vrcp.f32 %v1018_v21 }
 0x381   :  { %v2823_v15 = vpop.eup %2822 }
 0x382   :  { %v2825_v17 = vpop.eup %2824  ;;  %v1022_v20 = vmul.f32 %v2823_v15, %v2821_v12 }
 0x383   :  { %v1021_v24 = vmul.f32 %v2825_v17, %v3351_v30  ;;  %v2827_v33 = vpop.eup %2826 }
 0x385   :  { %v3393_v28 = vadd.f32 %v1022_v20, %v1021_v24 }
 0x387   :  { %2828 = vtanh.f32 %v3393_v28 }
 0x391   :  { %v2829_v34 = vpop.eup %2828 }
 0x392   :  { %v1025_v39 = vmul.f32 %v2829_v34, %v2827_v33 }
 0x394   :  { %1098 = vmatmul.mubr.f32.vlgmr.msra.gmra.mrb[6].mxu0 %v1025_v39  ;;  %1169 = vmatmul.mubr.f32.vlgmr.msra.gmra.mrb[6].mxu1 %v1025_v39 }
 0x395   :  { %2429 = vmatpush1.bf16.msra.mxu0 %v3148_v47  ;;  %2461 = vmatpush1.bf16.msra.mxu1 %v3151_v50 }
 0x396   :  { %2431 = vmatprep.subr.bf16.mxu0 %v3154_v53  ;;  %2463 = vmatprep.subr.bf16.mxu1 %v3156_v56 }
 0x397   :  { %1274 = vmatprep.mubr.f32.mxu0 %v3036_v0  ;;  %1345 = vmatprep.mubr.f32.mxu1 %v3036_v0 }
 0x399   :  { %2433 = vmatpush1.bf16.msra.mxu0 %v3159_v60  ;;  %2465 = vmatpush1.bf16.msra.mxu1 %v3163_v63 }
 0x39a   :  { %2435 = vmatprep.subr.bf16.mxu0 %v3167_v3  ;;  %2467 = vmatprep.subr.bf16.mxu1 %v3170_v6 }
 0x39d   :  { %2437 = vmatpush1.bf16.msra.mxu0 %v3173_v10  ;;  %2469 = vmatpush1.bf16.msra.mxu1 %v3177_v13 }
 0x39e   :  { %2439 = vmatprep.subr.bf16.mxu0 %v3181_v16  ;;  %2471 = vmatprep.subr.bf16.mxu1 %v3184_v19 }
 0x3a1   :  { %2441 = vmatpush1.bf16.msra.mxu0 %v3187_v23  ;;  %2473 = vmatpush1.bf16.msra.mxu1 %v3191_v26 }
 0x3a2   :  { %2443 = vmatprep.subr.bf16.mxu0 %v3195_v29  ;;  %2475 = vmatprep.subr.bf16.mxu1 %v3198_v32 }
 0x3a5   :  { %2445 = vmatpush1.bf16.msra.mxu0 %v3201_v36  ;;  %2477 = vmatpush1.bf16.msra.mxu1 %v3205_v40 }
 0x3a6   :  { %2447 = vmatprep.subr.bf16.mxu0 %v3209_v44  ;;  %2479 = vmatprep.subr.bf16.mxu1 %v3212_v48 }
 0x3a9   :  { %2449 = vmatpush1.bf16.msra.mxu0 %v3215_v54  ;;  %2481 = vmatpush1.bf16.msra.mxu1 %v3219_v58 }
 0x3aa   :  { %2451 = vmatprep.subr.bf16.mxu0 %v3223_v62  ;;  %2483 = vmatprep.subr.bf16.mxu1 %v3226_v4 }
 0x3ad   :  { %2453 = vmatpush1.bf16.msra.mxu0 %v3229_v9  ;;  %2485 = vmatpush1.bf16.msra.mxu1 %v3233_v14 }
 0x3ae   :  { %2455 = vmatprep.subr.bf16.mxu0 %v3237_v18  ;;  %2487 = vmatprep.subr.bf16.mxu1 %v3240_v22 }
 0x3b1   :  { %2457 = vmatpush1.bf16.msra.mxu0 %v3243_v25  ;;  %2489 = vmatpush1.bf16.msra.mxu1 %v3247_v27 }
 0x3b2   :  { %2491 = vmatprep.subr.bf16.mxu0 %v3144_v38  ;;  %2523 = vmatprep.subr.bf16.mxu1 %v3146_v41 }
 0x467   :  { %v1099_v30 = vpop.f32.mrb[6].mxu0  ;;  %v1170_v31 = vpop.f32.mrb[6].mxu1 }
 0x468   :  { %v2712_v42 = vadd.f32 %v1099_v30, %v3297_v35  ;;  %v1101_v43 = vpop.f32.mrb[7].mxu0  ;;  %v1172_v45 = vpop.f32.mrb[7].mxu1  ;;  %v2728_v59 = vadd.f32 %v1170_v31, %v3306_v1 }
 0x469   :  { %v2713_v46 = vadd.f32 %v1101_v43, %v3299_v37  ;;  %v2729_v52 = vadd.f32 %v1172_v45, %v3303_v57 }
 0x46a   :  { %v2038_v49 = vmul.f32 -1.442695, %v2712_v42 }
 0x46b   :  { %v2039_v51 = vmul.f32 -1.442695, %v2713_v46  ;;  %v2040_v55 = vmul.f32 -1.442695, %v2729_v52 }
 0x46c   :  { %2830 = vpow2.f32 %v2038_v49 }
 0x46d   :  { %2832 = vpow2.f32 %v2039_v51 }
 0x46e   :  { %2834 = vpow2.f32 %v2040_v55 }
 0x46f   :  { %2836 = vtanh.f32 %v2728_v59 }
 0x476   :  { %v2831_v61 = vpop.eup %2830 }
 0x477   :  { %v2833_v2 = vpop.eup %2832  ;;  %v1182_v5 = vadd.f32 1.0, %v2831_v61 }
 0x478   :  { %v1188_v7 = vadd.f32 1.0, %v2833_v2  ;;  %v2835_v8 = vpop.eup %2834 }
 0x479   :  { %2838 = vrcp.f32 %v1182_v5  ;;  %v2837_v11 = vpop.eup %2836  ;;  %v1195_v20 = vadd.f32 1.0, %v2835_v8 }
 0x47a   :  { %2840 = vrcp.f32 %v1188_v7 }
 0x47b   :  { %2842 = vrcp.f32 %v1195_v20 }
 0x483   :  { %v2839_v12 = vpop.eup %2838 }
 0x484   :  { %v2841_v15 = vpop.eup %2840  ;;  %v1199_v17 = vmul.f32 %v2839_v12, %v2837_v11 }
 0x485   :  { %v1198_v21 = vmul.f32 %v2841_v15, %v3393_v28  ;;  %v2843_v33 = vpop.eup %2842 }
 0x487   :  { %v3435_v24 = vadd.f32 %v1199_v17, %v1198_v21 }
 0x489   :  { %2844 = vtanh.f32 %v3435_v24 }
 0x493   :  { %v2845_v34 = vpop.eup %2844 }
 0x494   :  { %v1202_v39 = vmul.f32 %v2845_v34, %v2843_v33 }
 0x496   :  { %1275 = vmatmul.mubr.f32.vlgmr.msra.gmra.mrb[8].mxu0 %v1202_v39  ;;  %1346 = vmatmul.mubr.f32.vlgmr.msra.gmra.mrb[8].mxu1 %v1202_v39 }
 0x497   :  { %2493 = vmatpush1.bf16.msra.mxu0 %v3148_v47  ;;  %2525 = vmatpush1.bf16.msra.mxu1 %v3151_v50 }
 0x498   :  { %2495 = vmatprep.subr.bf16.mxu0 %v3154_v53  ;;  %2527 = vmatprep.subr.bf16.mxu1 %v3156_v56 }
 0x499   :  { %1451 = vmatprep.mubr.f32.mxu0 %v3036_v0  ;;  %1522 = vmatprep.mubr.f32.mxu1 %v3036_v0 }
 0x49b   :  { %2497 = vmatpush1.bf16.msra.mxu0 %v3159_v60  ;;  %2529 = vmatpush1.bf16.msra.mxu1 %v3163_v63 }
 0x49c   :  { %2499 = vmatprep.subr.bf16.mxu0 %v3167_v3  ;;  %2531 = vmatprep.subr.bf16.mxu1 %v3170_v6 }
 0x49f   :  { %2501 = vmatpush1.bf16.msra.mxu0 %v3173_v10  ;;  %2533 = vmatpush1.bf16.msra.mxu1 %v3177_v13 }
 0x4a0   :  { %2503 = vmatprep.subr.bf16.mxu0 %v3181_v16  ;;  %2535 = vmatprep.subr.bf16.mxu1 %v3184_v19 }
 0x4a3   :  { %2505 = vmatpush1.bf16.msra.mxu0 %v3187_v23  ;;  %2537 = vmatpush1.bf16.msra.mxu1 %v3191_v26 }
 0x4a4   :  { %2507 = vmatprep.subr.bf16.mxu0 %v3195_v29  ;;  %2539 = vmatprep.subr.bf16.mxu1 %v3198_v32 }
 0x4a7   :  { %2509 = vmatpush1.bf16.msra.mxu0 %v3201_v36  ;;  %2541 = vmatpush1.bf16.msra.mxu1 %v3205_v40 }
 0x4a8   :  { %2511 = vmatprep.subr.bf16.mxu0 %v3209_v44  ;;  %2543 = vmatprep.subr.bf16.mxu1 %v3212_v48 }
 0x4ab   :  { %2513 = vmatpush1.bf16.msra.mxu0 %v3215_v54  ;;  %2545 = vmatpush1.bf16.msra.mxu1 %v3219_v58 }
 0x4ac   :  { %2515 = vmatprep.subr.bf16.mxu0 %v3223_v62  ;;  %2547 = vmatprep.subr.bf16.mxu1 %v3226_v4 }
 0x4af   :  { %2517 = vmatpush1.bf16.msra.mxu0 %v3229_v9  ;;  %2549 = vmatpush1.bf16.msra.mxu1 %v3233_v14 }
 0x4b0   :  { %2519 = vmatprep.subr.bf16.mxu0 %v3237_v18  ;;  %2551 = vmatprep.subr.bf16.mxu1 %v3240_v22 }
 0x4b3   :  { %2521 = vmatpush1.bf16.msra.mxu0 %v3243_v25  ;;  %2553 = vmatpush1.bf16.msra.mxu1 %v3247_v27 }
 0x4b4   :  { %2555 = vmatprep.subr.bf16.mxu0 %v3144_v38  ;;  %2587 = vmatprep.subr.bf16.mxu1 %v3146_v41 }
 0x569   :  { %v1276_v28 = vpop.f32.mrb[8].mxu0  ;;  %v1347_v30 = vpop.f32.mrb[8].mxu1 }
 0x56a   :  { %v2714_v31 = vadd.f32 %v1276_v28, %v3297_v35  ;;  %v1278_v42 = vpop.f32.mrb[9].mxu0  ;;  %v1349_v43 = vpop.f32.mrb[9].mxu1  ;;  %v2730_v55 = vadd.f32 %v1347_v30, %v3306_v1 }
 0x56b   :  { %v2715_v45 = vadd.f32 %v1278_v42, %v3299_v37  ;;  %v2731_v51 = vadd.f32 %v1349_v43, %v3303_v57 }
 0x56c   :  { %v2041_v46 = vmul.f32 -1.442695, %v2714_v31 }
 0x56d   :  { %v2042_v49 = vmul.f32 -1.442695, %v2715_v45  ;;  %v2043_v52 = vmul.f32 -1.442695, %v2731_v51 }
 0x56e   :  { %2846 = vpow2.f32 %v2041_v46 }
 0x56f   :  { %2848 = vpow2.f32 %v2042_v49 }
 0x570   :  { %2850 = vpow2.f32 %v2043_v52 }
 0x571   :  { %2852 = vtanh.f32 %v2730_v55 }
 0x578   :  { %v2847_v59 = vpop.eup %2846 }
 0x579   :  { %v2849_v61 = vpop.eup %2848  ;;  %v1359_v2 = vadd.f32 1.0, %v2847_v59 }
 0x57a   :  { %v1365_v5 = vadd.f32 1.0, %v2849_v61  ;;  %v2851_v7 = vpop.eup %2850 }
 0x57b   :  { %2854 = vrcp.f32 %v1359_v2  ;;  %v2853_v8 = vpop.eup %2852  ;;  %v1372_v17 = vadd.f32 1.0, %v2851_v7 }
 0x57c   :  { %2856 = vrcp.f32 %v1365_v5 }
 0x57d   :  { %2858 = vrcp.f32 %v1372_v17 }
 0x585   :  { %v2855_v11 = vpop.eup %2854 }
 0x586   :  { %v2857_v12 = vpop.eup %2856  ;;  %v1376_v15 = vmul.f32 %v2855_v11, %v2853_v8 }
 0x587   :  { %v1375_v20 = vmul.f32 %v2857_v12, %v3435_v24  ;;  %v2859_v33 = vpop.eup %2858 }
 0x589   :  { %v3477_v21 = vadd.f32 %v1376_v15, %v1375_v20 }
 0x58b   :  { %2860 = vtanh.f32 %v3477_v21 }
 0x595   :  { %v2861_v34 = vpop.eup %2860 }
 0x596   :  { %v1379_v39 = vmul.f32 %v2861_v34, %v2859_v33  ;;  %v1914_v34 = vld [vmem:[#allocation9 + $0x18] sm:$0xff] }
 0x598   :  { %1452 = vmatmul.mubr.f32.vlgmr.msra.gmra.mrb[10].mxu0 %v1379_v39  ;;  %1523 = vmatmul.mubr.f32.vlgmr.msra.gmra.mrb[10].mxu1 %v1379_v39 }
 0x599   :  { %2557 = vmatpush1.bf16.msra.mxu0 %v3148_v47  ;;  %2589 = vmatpush1.bf16.msra.mxu1 %v3151_v50 }
 0x59a   :  { %2559 = vmatprep.subr.bf16.mxu0 %v3154_v53  ;;  %2591 = vmatprep.subr.bf16.mxu1 %v3156_v56 }
 0x59b   :  { %1628 = vmatprep.mubr.f32.mxu0 %v3036_v0  ;;  %1699 = vmatprep.mubr.f32.mxu1 %v3036_v0 }
 0x59d   :  { %2561 = vmatpush1.bf16.msra.mxu0 %v3159_v60  ;;  %2593 = vmatpush1.bf16.msra.mxu1 %v3163_v63 }
 0x59e   :  { %2563 = vmatprep.subr.bf16.mxu0 %v3167_v3  ;;  %2595 = vmatprep.subr.bf16.mxu1 %v3170_v6 }
 0x5a1   :  { %2565 = vmatpush1.bf16.msra.mxu0 %v3173_v10  ;;  %2597 = vmatpush1.bf16.msra.mxu1 %v3177_v13 }
 0x5a2   :  { %2567 = vmatprep.subr.bf16.mxu0 %v3181_v16  ;;  %2599 = vmatprep.subr.bf16.mxu1 %v3184_v19 }
 0x5a5   :  { %2569 = vmatpush1.bf16.msra.mxu0 %v3187_v23  ;;  %2601 = vmatpush1.bf16.msra.mxu1 %v3191_v26 }
 0x5a6   :  { %2571 = vmatprep.subr.bf16.mxu0 %v3195_v29  ;;  %2603 = vmatprep.subr.bf16.mxu1 %v3198_v32 }
 0x5a9   :  { %2573 = vmatpush1.bf16.msra.mxu0 %v3201_v36  ;;  %2605 = vmatpush1.bf16.msra.mxu1 %v3205_v40 }
 0x5aa   :  { %2575 = vmatprep.subr.bf16.mxu0 %v3209_v44  ;;  %2607 = vmatprep.subr.bf16.mxu1 %v3212_v48 }
 0x5ad   :  { %2577 = vmatpush1.bf16.msra.mxu0 %v3215_v54  ;;  %2609 = vmatpush1.bf16.msra.mxu1 %v3219_v58 }
 0x5ae   :  { %2579 = vmatprep.subr.bf16.mxu0 %v3223_v62  ;;  %2611 = vmatprep.subr.bf16.mxu1 %v3226_v4 }
 0x5b1   :  { %2581 = vmatpush1.bf16.msra.mxu0 %v3229_v9  ;;  %2613 = vmatpush1.bf16.msra.mxu1 %v3233_v14 }
 0x5b2   :  { %2583 = vmatprep.subr.bf16.mxu0 %v3237_v18  ;;  %2615 = vmatprep.subr.bf16.mxu1 %v3240_v22 }
 0x5b5   :  { %2585 = vmatpush1.bf16.msra.mxu0 %v3243_v25  ;;  %2617 = vmatpush1.bf16.msra.mxu1 %v3247_v27 }
 0x5b6   :  { %2619 = vmatprep.subr.bf16.mxu0 %v3144_v38  ;;  %2651 = vmatprep.subr.bf16.mxu1 %v3146_v41 }
 0x66b   :  { %v1453_v24 = vpop.f32.mrb[10].mxu0  ;;  %v1524_v28 = vpop.f32.mrb[10].mxu1 }
 0x66c   :  { %v2716_v30 = vadd.f32 %v1453_v24, %v3297_v35  ;;  %v1455_v31 = vpop.f32.mrb[11].mxu0  ;;  %v1526_v42 = vpop.f32.mrb[11].mxu1  ;;  %v2732_v52 = vadd.f32 %v1524_v28, %v3306_v1  ;;  %v1915_v24 = vld [vmem:[#allocation9 + $0x20] sm:$0xff]  ;;  %v1916_v28 = vld [vmem:[#allocation9 + $0x28] sm:$0xff] }
 0x66d   :  { %v2717_v43 = vadd.f32 %v1455_v31, %v3299_v37  ;;  %v2733_v49 = vadd.f32 %v1526_v42, %v3303_v57  ;;  %v1917_v31 = vld [vmem:[#allocation9 + $0x30] sm:$0xff]  ;;  %v1918_v42 = vld [vmem:[#allocation9 + $0x38] sm:$0xff] }
 0x66e   :  { %v2044_v45 = vmul.f32 -1.442695, %v2716_v30  ;;  %v2689_v30 = vpack.c.bf16 %v1916_v28, %v1915_v24 }
 0x66f   :  { %v2045_v46 = vmul.f32 -1.442695, %v2717_v43  ;;  %v2046_v51 = vmul.f32 -1.442695, %v2733_v49  ;;  %v2692_v43 = vpack.c.bf16 %v1918_v42, %v1917_v31 }
 0x670   :  { %2862 = vpow2.f32 %v2044_v45  ;;  %v1919_v45 = vld [vmem:[#allocation9 + $0x40] sm:$0xff] }
 0x671   :  { %2864 = vpow2.f32 %v2045_v46  ;;  %v1920_v46 = vld [vmem:[#allocation9 + $0x48] sm:$0xff] }
 0x672   :  { %2866 = vpow2.f32 %v2046_v51  ;;  %v2695_v49 = vpack.c.bf16 %v1920_v46, %v1919_v45  ;;  %v1921_v51 = vld [vmem:[#allocation9 + $0x50] sm:$0xff] }
 0x673   :  { %2868 = vtanh.f32 %v2732_v52  ;;  %v1922_v52 = vld [vmem:[#allocation9 + $0x58] sm:$0xff] }
 0x67a   :  { %v2863_v38 = vpop.eup %2862 }
 0x67b   :  { %v2865_v55 = vpop.eup %2864  ;;  %v1536_v41 = vadd.f32 1.0, %v2863_v38  ;;  %v1923_v38 = vld [vmem:[#allocation9 + $0x60] sm:$0xff] }
 0x67c   :  { %v1542_v59 = vadd.f32 1.0, %v2865_v55  ;;  %v2867_v61 = vpop.eup %2866  ;;  %v2698_v55 = vpack.c.bf16 %v1922_v52, %v1921_v51 }
 0x67d   :  { %2870 = vrcp.f32 %v1536_v41  ;;  %v2869_v2 = vpop.eup %2868  ;;  %v1549_v11 = vadd.f32 1.0, %v2867_v61  ;;  %v1924_v41 = vld [vmem:[#allocation9 + $0x68] sm:$0xff]  ;;  %v1925_v61 = vld [vmem:[#allocation9 + $0x70] sm:$0xff] }
 0x67e   :  { %2872 = vrcp.f32 %v1542_v59  ;;  %v2701_v59 = vpack.c.bf16 %v1924_v41, %v1923_v38 }
 0x67f   :  { %2874 = vrcp.f32 %v1549_v11 }
 0x687   :  { %v2871_v5 = vpop.eup %2870 }
 0x688   :  { %v2873_v7 = vpop.eup %2872  ;;  %v1553_v8 = vmul.f32 %v2871_v5, %v2869_v2  ;;  %v1926_v2 = vld [vmem:[#allocation9 + $0x78] sm:$0xff] }
 0x689   :  { %v1552_v12 = vmul.f32 %v2873_v7, %v3477_v21  ;;  %v2875_v17 = vpop.eup %2874  ;;  %v1913_v21 = vld [vmem:[#allocation9 + $0x10] sm:$0xff]  ;;  %v2704_v5 = vpack.c.bf16 %v1926_v2, %v1925_v61 }
 0x68a   :  { %v2686_v39 = vpack.c.bf16 %v1914_v34, %v1913_v21 }
 0x68b   :  { %v3519_v15 = vadd.f32 %v1553_v8, %v1552_v12 }
 0x68d   :  { %2876 = vtanh.f32 %v3519_v15 }
 0x697   :  { %v2877_v20 = vpop.eup %2876 }
 0x698   :  { %v1556_v33 = vmul.f32 %v2877_v20, %v2875_v17 }
 0x69a   :  { %1629 = vmatmul.mubr.f32.vlgmr.msra.gmra.mrb[12].mxu0 %v1556_v33  ;;  %1700 = vmatmul.mubr.f32.vlgmr.msra.gmra.mrb[12].mxu1 %v1556_v33 }
 0x69b   :  { %2621 = vmatpush1.bf16.msra.mxu0 %v3148_v47  ;;  %2653 = vmatpush1.bf16.msra.mxu1 %v3151_v50 }
 0x69c   :  { %2623 = vmatprep.subr.bf16.mxu0 %v3154_v53  ;;  %2655 = vmatprep.subr.bf16.mxu1 %v3156_v56 }
 0x69d   :  { %1805 = vmatprep.mubr.f32.mxu0 %v3036_v0  ;;  %1876 = vmatprep.mubr.f32.mxu1 %v3036_v0 }
 0x69f   :  { %2625 = vmatpush1.bf16.msra.mxu0 %v3159_v60  ;;  %2657 = vmatpush1.bf16.msra.mxu1 %v3163_v63 }
 0x6a0   :  { %2627 = vmatprep.subr.bf16.mxu0 %v3167_v3  ;;  %2659 = vmatprep.subr.bf16.mxu1 %v3170_v6 }
 0x6a3   :  { %2629 = vmatpush1.bf16.msra.mxu0 %v3173_v10  ;;  %2661 = vmatpush1.bf16.msra.mxu1 %v3177_v13 }
 0x6a4   :  { %2631 = vmatprep.subr.bf16.mxu0 %v3181_v16  ;;  %2663 = vmatprep.subr.bf16.mxu1 %v3184_v19 }
 0x6a7   :  { %2633 = vmatpush1.bf16.msra.mxu0 %v3187_v23  ;;  %2665 = vmatpush1.bf16.msra.mxu1 %v3191_v26 }
 0x6a8   :  { %2635 = vmatprep.subr.bf16.mxu0 %v3195_v29  ;;  %2667 = vmatprep.subr.bf16.mxu1 %v3198_v32 }
 0x6ab   :  { %2637 = vmatpush1.bf16.msra.mxu0 %v3201_v36  ;;  %2669 = vmatpush1.bf16.msra.mxu1 %v3205_v40 }
 0x6ac   :  { %2639 = vmatprep.subr.bf16.mxu0 %v3209_v44  ;;  %2671 = vmatprep.subr.bf16.mxu1 %v3212_v48 }
 0x6af   :  { %2641 = vmatpush1.bf16.msra.mxu0 %v3215_v54  ;;  %2673 = vmatpush1.bf16.msra.mxu1 %v3219_v58 }
 0x6b0   :  { %2643 = vmatprep.subr.bf16.mxu0 %v3223_v62  ;;  %2675 = vmatprep.subr.bf16.mxu1 %v3226_v4 }
 0x6b3   :  { %2645 = vmatpush1.bf16.msra.mxu0 %v3229_v9  ;;  %2677 = vmatpush1.bf16.msra.mxu1 %v3233_v14 }
 0x6b4   :  { %2647 = vmatprep.subr.bf16.mxu0 %v3237_v18  ;;  %2679 = vmatprep.subr.bf16.mxu1 %v3240_v22  ;;  %v1911_v18 = vld [vmem:[#allocation9] sm:$0xff]  ;;  %v1912_v22 = vld [vmem:[#allocation9 + $0x8] sm:$0xff] }
 0x6b7   :  { %2649 = vmatpush1.bf16.msra.mxu0 %v3243_v25  ;;  %2681 = vmatpush1.bf16.msra.mxu1 %v3247_v27  ;;  %v2683_v25 = vpack.c.bf16 %v1912_v22, %v1911_v18  ;;  %v3037_v27 = vmov 0.0|0.0  }
 0x6b8   :  { %2682 = vmatprep.subr.bf16.mxu0 %v3037_v27 }
 0x76d   :  { %v1630_v47 = vpop.f32.mrb[12].mxu0  ;;  %v1701_v50 = vpop.f32.mrb[12].mxu1 }
 0x76e   :  { %v2718_v53 = vadd.f32 %v1630_v47, %v3297_v35  ;;  %v1632_v56 = vpop.f32.mrb[13].mxu0  ;;  %v1703_v60 = vpop.f32.mrb[13].mxu1  ;;  %v2734_v16 = vadd.f32 %v1701_v50, %v3306_v1 }
 0x76f   :  { %v2719_v63 = vadd.f32 %v1632_v56, %v3299_v37  ;;  %v2735_v10 = vadd.f32 %v1703_v60, %v3303_v57 }
 0x770   :  { %v2047_v3 = vmul.f32 -1.442695, %v2718_v53 }
 0x771   :  { %v2048_v6 = vmul.f32 -1.442695, %v2719_v63  ;;  %v2049_v13 = vmul.f32 -1.442695, %v2735_v10 }
 0x772   :  { %2878 = vpow2.f32 %v2047_v3 }
 0x773   :  { %2880 = vpow2.f32 %v2048_v6 }
 0x774   :  { %2882 = vpow2.f32 %v2049_v13 }
 0x775   :  { %2884 = vtanh.f32 %v2734_v16 }
 0x77c   :  { %v2879_v19 = vpop.eup %2878 }
 0x77d   :  { %v2881_v23 = vpop.eup %2880  ;;  %v1713_v26 = vadd.f32 1.0, %v2879_v19 }
 0x77e   :  { %v1719_v29 = vadd.f32 1.0, %v2881_v23  ;;  %v2883_v32 = vpop.eup %2882 }
 0x77f   :  { %2886 = vrcp.f32 %v1713_v26  ;;  %v2885_v36 = vpop.eup %2884  ;;  %v1726_v54 = vadd.f32 1.0, %v2883_v32  ;;  %v2053_v26 = vld [vmem:[%s3588_s5] ss:$0 sm:$0xff] }
 0x780   :  { %2888 = vrcp.f32 %v1719_v29 }
 0x781   :  { %2890 = vrcp.f32 %v1726_v54 }
 0x789   :  { %v2887_v40 = vpop.eup %2886 }
 0x78a   :  { %v2889_v44 = vpop.eup %2888  ;;  %v1730_v48 = vmul.f32 %v2887_v40, %v2885_v36 }
 0x78b   :  { %v1729_v58 = vmul.f32 %v2889_v44, %v3519_v15  ;;  %v2891_v4 = vpop.eup %2890 }
 0x78d   :  { %v3559_v62 = vadd.f32 %v1730_v48, %v1729_v58 }
 0x78f   :  { %2892 = vtanh.f32 %v3559_v62 }
 0x799   :  { %v2893_v9 = vpop.eup %2892 }
 0x79a   :  { %v1733_v14 = vmul.f32 %v2893_v9, %v2891_v4 }
 0x79c   :  { %1806 = vmatmul.mubr.f32.vlgmr.msra.gmra.mrb[14].mxu0 %v1733_v14  ;;  %1877 = vmatmul.mubr.f32.vlgmr.msra.gmra.mrb[14].mxu1 %v1733_v14 }
 0x79d   :  { %2684 = vmatpush3.bf16.msra.mxu0 %v2683_v25  ;;  %2103 = vmatprep.mubr.msk.f32.mxu0 %vm3038_vm0, %v3036_v0 }
 0x79e   :  { %2685 = vmatprep.subr.bf16.mxu0 %v3037_v27 }
 0x7a1   :  { %2687 = vmatpush3.bf16.msra.mxu0 %v2686_v39 }
 0x7a2   :  { %2688 = vmatprep.subr.bf16.mxu0 %v3037_v27 }
 0x7a5   :  { %2690 = vmatpush3.bf16.msra.mxu0 %v2689_v30 }
 0x7a6   :  { %2691 = vmatprep.subr.bf16.mxu0 %v3037_v27 }
 0x7a9   :  { %2693 = vmatpush3.bf16.msra.mxu0 %v2692_v43 }
 0x7aa   :  { %2694 = vmatprep.subr.bf16.mxu0 %v3037_v27 }
 0x7ad   :  { %2696 = vmatpush3.bf16.msra.mxu0 %v2695_v49 }
 0x7ae   :  { %2697 = vmatprep.subr.bf16.mxu0 %v3037_v27 }
 0x7b1   :  { %2699 = vmatpush3.bf16.msra.mxu0 %v2698_v55 }
 0x7b2   :  { %2700 = vmatprep.subr.bf16.mxu0 %v3037_v27 }
 0x7b5   :  { %2702 = vmatpush3.bf16.msra.mxu0 %v2701_v59 }
 0x7b6   :  { %2703 = vmatprep.subr.bf16.mxu0 %v3037_v27 }
 0x7b9   :  { %2705 = vmatpush3.bf16.msra.mxu0 %v2704_v5 }
 0x86f   :  { %v1807_v7 = vpop.f32.mrb[14].mxu0  ;;  %v1878_v8 = vpop.f32.mrb[14].mxu1 }
 0x870   :  { %v2720_v11 = vadd.f32 %v1807_v7, %v3297_v35  ;;  %v1809_v12 = vpop.f32.mrb[15].mxu0  ;;  %v1880_v15 = vpop.f32.mrb[15].mxu1  ;;  %v2736_v50 = vadd.f32 %v1878_v8, %v3306_v1 }
 0x871   :  { %v2721_v17 = vadd.f32 %v1809_v12, %v3299_v37  ;;  %v2737_v0 = vadd.f32 %v1880_v15, %v3303_v57 }
 0x872   :  { %v2050_v20 = vmul.f32 -1.442695, %v2720_v11 }
 0x873   :  { %v2051_v33 = vmul.f32 -1.442695, %v2721_v17  ;;  %v2052_v47 = vmul.f32 -1.442695, %v2737_v0 }
 0x874   :  { %2894 = vpow2.f32 %v2050_v20 }
 0x875   :  { %2896 = vpow2.f32 %v2051_v33 }
 0x876   :  { %2898 = vpow2.f32 %v2052_v47 }
 0x877   :  { %2900 = vtanh.f32 %v2736_v50 }
 0x87e   :  { %v2895_v53 = vpop.eup %2894 }
 0x87f   :  { %v2897_v56 = vpop.eup %2896  ;;  %v1890_v60 = vadd.f32 1.0, %v2895_v53 }
 0x880   :  { %v1896_v63 = vadd.f32 1.0, %v2897_v56  ;;  %v2899_v35 = vpop.eup %2898 }
 0x881   :  { %2902 = vrcp.f32 %v1890_v60  ;;  %v2901_v3 = vpop.eup %2900  ;;  %v1903_v13 = vadd.f32 1.0, %v2899_v35 }
 0x882   :  { %2904 = vrcp.f32 %v1896_v63 }
 0x883   :  { %2906 = vrcp.f32 %v1903_v13 }
 0x88b   :  { %v2903_v37 = vpop.eup %2902 }
 0x88c   :  { %v2905_v6 = vpop.eup %2904  ;;  %v1907_v10 = vmul.f32 %v2903_v37, %v2901_v3 }
 0x88d   :  { %v1906_v16 = vmul.f32 %v2905_v6, %v3559_v62  ;;  %v2907_v1 = vpop.eup %2906 }
 0x88f   :  { %v1908_v57 = vadd.f32 %v1907_v10, %v1906_v16 }
 0x891   :  { %2908 = vtanh.f32 %v1908_v57 }
 0x89b   :  { %v2909_v19 = vpop.eup %2908 }
 0x89c   :  { %v1910_v23 = vmul.f32 %v2909_v19, %v2907_v1 }
 0x89e   :  { %2104 = vmatmul.mubr.f32.vlgmr.msra.gmra.mrb[16].mxu0 %v1910_v23 }
 0x971   :  { %v2000_v29 = vpop.f32.mrb[16].mxu0 }
 0x972   :  { %v2001_v32 = vadd.f32 %v2053_v26, %v2000_v29  ;;  %v2105_v36 = vpop.f32.mrb[17].mxu0 }
 0x974   :  { %2004 = vst [vmem:[#allocation11] sm:$0xff] %v2001_v32 }
 0x975   :  { %3009 = shalt.err (!%p3006_p8)
}
 0x976   :  { %s3010_s28 = scalar_lea.hbm %s3589_s6, 128 }
 0x977   :  { %p3011_p9 = scmp.ne.s32.totalorder %s3589_s6, %s3010_s28  ;;  %p3014_p10 = scmp.lt.u32.totalorder %s3010_s28, %s3589_s6 }
 0x979   :  { %p3016_p11 = pnand %p3014_p10, %p3011_p9 }
 0x97b   :  { %3019 = shalt.err (!%p3016_p11)
}
 0x97c   :  { %2014 = dma.vmem_to_hbm [thread:$0]  %s2012_s24, 128, %s3589_s6, [#allocation5]  }
 0x97d   :  { %3026 = dma.done.wait [#allocation5], 128  }
 0x97e   :  { %3027 = vsyncadd [#allocation5], 4294967168 }
 0x97f   :  { %2018 = vsyncpa [#allocation4], 1 }
 0x980   :  { %2019 = vsyncpa [#allocation7], 1 }
 0x981   :  { %2020 = vsyncpa [#allocation10], 1 }
 0x982   :  { %2021 = vsyncpa [#allocation5], 1 }

</bundles_post_ra>
